<compile_context>
chip_gen: v7x
topology: tpu7x:2x2x1
jax: 0.10.0
libtpu: 0.0.40
codegen_flags: <defaults>
</compile_context>

<pallas_src>
import functools

import jax
import jax.numpy as jnp
from jax import lax
from jax.experimental import pallas as pl
from jax.experimental.pallas import tpu as pltpu


def _snr_attention_kernel(snr_ref, cw_ref, x_ref, hmap_ref, wmap_ref,
                          w1a_ref, w1s_ref, b1_ref, w2_ref, b2_ref,
                          out_ref, *, H, W):
    NB, C, HW = x_ref.shape
    inv_hw = 1.0 / float(HW)
    inv_c = 1.0 / float(C)

    snr = snr_ref[0]
    hmap = hmap_ref[...]                     # (1, HW) int32 row index per lane
    wmap = wmap_ref[...]                     # (1, HW) int32 col index per lane

    # Precompute the 9 conv taps once per block (loop-invariant, hoisted):
    # lane-rotation amount, zero-padding validity mask, and the two scalar
    # weights (avg channel / max channel).  SpatialAttention conv has bias=False.
    taps = []
    for dh in (-1, 0, 1):
        if dh == -1:
            h_ok = hmap >= 1
        elif dh == 1:
            h_ok = hmap <= (H - 2)
        else:
            h_ok = None
        for dw in (-1, 0, 1):
            if dw == -1:
                w_ok = wmap >= 1
            elif dw == 1:
                w_ok = wmap <= (W - 2)
            else:
                w_ok = None
            if h_ok is None:
                valid = w_ok
            elif w_ok is None:
                valid = h_ok
            else:
                valid = jnp.logical_and(h_ok, w_ok)
            rot = (-(dh * W + dw)) % HW      # roll amount so out[p] = in[p + dh*W + dw]
            kidx = (dh + 1) * 3 + (dw + 1)
            taps.append((rot, valid, cw_ref[kidx], cw_ref[9 + kidx]))

    def per_image(i, carry):
        xi = x_ref[i].astype(jnp.float32)                  # (C, HW), f32 compute

        # ---- per-channel spatial mean (lane reduction) -> (C, 1) ----
        mean_col = jnp.sum(xi, axis=-1, keepdims=True) * inv_hw

        # ---- channel-gate MLP, column-oriented (snr column of layer1 split
        #      out, so no concat / relayout is needed). ----
        h1 = (jnp.dot(w1a_ref[...], mean_col, preferred_element_type=jnp.float32)
              + snr * w1s_ref[...] + b1_ref[...])          # (hidden, 1)
        h1 = jnp.maximum(h1, 0.0)
        logits = (jnp.dot(w2_ref[...], h1, preferred_element_type=jnp.float32)
                  + b2_ref[...])                           # (C, 1)
        factor = jax.nn.sigmoid(logits)                    # (C, 1)

        # ---- spatial attention input: channel avg/max of the gated feature.
        # The product feeds the reductions and is not kept live across the
        # conv; the final store recomputes it (cheap VPU mul) instead of
        # spilling/reloading a full (C, HW) temporary.
        prod = xi * factor                                 # (C, HW)
        avg_map = jnp.sum(prod, axis=0, keepdims=True) * inv_c   # (1, HW)
        max_map = jnp.max(prod, axis=0, keepdims=True)           # (1, HW)
        maps = jnp.concatenate([avg_map, max_map], axis=0)       # (2, HW)

        # 3x3 conv, zero padding, bias=False: 9 lane rotations + edge masks.
        conv = jnp.zeros((1, HW), jnp.float32)
        for rot, valid, w_avg, w_max in taps:
            shifted = maps if rot == 0 else pltpu.roll(maps, shift=rot, axis=1)
            contrib = w_avg * shifted[0:1, :] + w_max * shifted[1:2, :]
            if valid is not None:
                contrib = jnp.where(valid, contrib, 0.0)
            conv = conv + contrib
        sa = jax.nn.sigmoid(conv)                          # (1, HW)

        out_ref[i] = ((xi * factor) * sa).astype(out_ref.dtype)
        return carry

    if NB == 1:
        per_image(0, 0)
    else:
        lax.fori_loop(0, NB, per_image, 0)


def snr_attention_forward(x_nchw, snr, params):
    """Pallas implementation of Snr_attention_module.forward (NCHW in/out)."""
    W1, b1, W2, b2, conv_w = (params["W1"], params["b1"], params["W2"],
                              params["b2"], params["conv_w"])
    N, C, H, Wd = x_nchw.shape
    hidden = C // 16
    HW = H * Wd

    # Native-dtype contiguous view (no wrapper-side f32 cast -> no extra HBM pass).
    x = x_nchw.reshape(N, C, HW)
    # TODO(synk): if H*W is not a multiple of 128, pad HW in the wrapper so
    # output stores stay lane-dense (currently they'd be masked partial stores).

    # Column-oriented weights (PyTorch Linear weights are (out, in)).
    w1a = W1[:, :C].astype(jnp.float32)                    # (hidden, C)
    w1s = W1[:, C:C + 1].astype(jnp.float32)               # (hidden, 1) snr column
    b1c = b1[:, None].astype(jnp.float32)                  # (hidden, 1)
    w2 = W2.astype(jnp.float32)                            # (C, hidden)
    b2c = b2[:, None].astype(jnp.float32)                  # (C, 1)
    cwf = conv_w.reshape(-1).astype(jnp.float32)           # (18,), (in_ch, kh, kw)
    snr_arr = jnp.asarray([snr], dtype=jnp.float32)

    # Row/col index of each flattened spatial position (for conv edge masks).
    # Passed in rather than built in-kernel: avoids in-kernel integer div/mod.
    idx = jnp.arange(HW, dtype=jnp.int32)
    hmap = (idx // Wd)[None, :]                            # (1, HW)
    wmap = (idx % Wd)[None, :]                             # (1, HW)

    # ---- block / grid selection -------------------------------------------
    itemsize = jnp.dtype(x.dtype).itemsize
    per_image_bytes = C * HW * itemsize
    # (a) ~6 MiB block target: double-buffered in+out blocks (~24 MiB) plus
    #     resident weights/index maps fit well under the 48 MiB VMEM limit.
    bytes_cap = max(1, (6 * 1024 * 1024) // per_image_bytes)
    # (b) keep the grid multi-step (>= min(N,4) steps, never 1 when N > 1) so
    #     the pipeline overlaps DMA with compute and v7x shards the batch axis.
    steps_cap = max(1, N // min(N, 4))
    nb_cap = max(1, min(8, bytes_cap, steps_cap))
    divisors = [d for d in range(1, nb_cap + 1) if N % d == 0]
    even_grid = [d for d in divisors if (N // d) % 2 == 0]
    nb = max(even_grid) if even_grid else max(divisors)
    grid = (N // nb,)
    # TODO(synk): prime/awkward N falls back to nb=1; a cdiv grid with a
    # guarded ragged last block would keep blocks multi-MiB for any batch size.

    cost = pl.CostEstimate(
        flops=8 * N * C * HW,
        transcendentals=N * (C + HW),
        bytes_accessed=2 * N * C * HW * itemsize,
    )

    kernel = functools.partial(_snr_attention_kernel, H=H, W=Wd)

    out = pl.pallas_call(
        kernel,
        out_shape=jax.ShapeDtypeStruct((N, C, HW), x.dtype),
        grid_spec=pltpu.PrefetchScalarGridSpec(
            num_scalar_prefetch=0,
            grid=grid,
            in_specs=[
                pl.BlockSpec((1,), lambda n: (0,),
                             memory_space=pltpu.MemorySpace.SMEM),   # snr
                pl.BlockSpec((18,), lambda n: (0,),
                             memory_space=pltpu.MemorySpace.SMEM),   # conv weights
                pl.BlockSpec((nb, C, HW), lambda n: (n, 0, 0)),      # x (N,C,H*W)
                pl.BlockSpec((1, HW), lambda n: (0, 0)),             # row indices
                pl.BlockSpec((1, HW), lambda n: (0, 0)),             # col indices
                pl.BlockSpec((hidden, C), lambda n: (0, 0)),         # W1 feature part
                pl.BlockSpec((hidden, 1), lambda n: (0, 0)),         # W1 snr column
                pl.BlockSpec((hidden, 1), lambda n: (0, 0)),         # b1
                pl.BlockSpec((C, hidden), lambda n: (0, 0)),         # W2
                pl.BlockSpec((C, 1), lambda n: (0, 0)),              # b2
            ],
            out_specs=pl.BlockSpec((nb, C, HW), lambda n: (n, 0, 0)),
        ),
        compiler_params=pltpu.CompilerParams(
            dimension_semantics=("parallel",),
            vmem_limit_bytes=48 * 1024 * 1024),
        cost_estimate=cost,
    )(snr_arr, cwf, x, hmap, wmap, w1a, w1s, b1c, w2, b2c)

    return out.reshape(N, C, H, Wd)


def snr_attention_reference(x_nchw, snr, params):
    """Pure-JAX reference matching the PyTorch forward (NCHW)."""
    W1, b1, W2, b2, conv_w = (params["W1"], params["b1"], params["W2"],
                              params["b2"], params["conv_w"])
    N, C, H, W = x_nchw.shape
    mean_c = jnp.mean(x_nchw.reshape(N, C, -1), axis=-1)            # (N, C)
    cat = jnp.concatenate([mean_c, jnp.full((N, 1), snr, jnp.float32)], axis=1)
    h = jax.nn.relu(cat @ W1.T + b1)
    f = jax.nn.sigmoid(h @ W2.T + b2)                               # (N, C)
    r = x_nchw * f[:, :, None, None]
    avg = jnp.mean(r, axis=1, keepdims=True)
    mx = jnp.max(r, axis=1, keepdims=True)
    inp = jnp.concatenate([avg, mx], axis=1)                        # (N, 2, H, W)
    conv = lax.conv_general_dilated(inp, conv_w, (1, 1),
                                    padding=((1, 1), (1, 1)),
                                    dimension_numbers=("NCHW", "OIHW", "NCHW"))
    sa = jax.nn.sigmoid(conv)                                       # (N, 1, H, W)
    return r * sa


if __name__ == "__main__":
    # Small-but-valid shapes: channel_num must be divisible by 16 (C//16 hidden).
    N, C, H, W = 2, 64, 16, 16
    hidden = C // 16
    snr = 5.0

    key = jax.random.PRNGKey(0)
    kx, k1, k2, k3, k4, k5 = jax.random.split(key, 6)
    x = jax.random.normal(kx, (N, C, H, W), jnp.float32)

    params = {
        "W1": 0.2 * jax.random.normal(k1, (hidden, C + 1), jnp.float32),
        "b1": 0.1 * jax.random.normal(k2, (hidden,), jnp.float32),
        "W2": 0.2 * jax.random.normal(k3, (C, hidden), jnp.float32),
        "b2": 0.1 * jax.random.normal(k4, (C,), jnp.float32),
        "conv_w": 0.3 * jax.random.normal(k5, (1, 2, 3, 3), jnp.float32),
    }

    out = snr_attention_forward(x, snr, params)
    out = jax.block_until_ready(out)

    ref = jax.block_until_ready(snr_attention_reference(x, snr, params))
    assert out.shape == (N, C, H, W)
    assert jnp.allclose(out, ref, rtol=1e-3, atol=1e-3), (
        float(jnp.max(jnp.abs(out - ref))))

    print("KERNEL_OK")
</pallas_src>

<mosaic_0001>
module attributes {stable_mosaic.version = 11 : i64} {
  func.func @_snr_attention_kernel(%arg0: i32, %arg1: memref<1xf32, #tpu.memory_space<smem>>, %arg2: memref<18xf32, #tpu.memory_space<smem>>, %arg3: memref<1x64x256xf32, #tpu.memory_space<vmem>>, %arg4: memref<1x256xi32, #tpu.memory_space<vmem>>, %arg5: memref<1x256xi32, #tpu.memory_space<vmem>>, %arg6: memref<4x64xf32, #tpu.memory_space<vmem>>, %arg7: memref<4x1xf32, #tpu.memory_space<vmem>>, %arg8: memref<4x1xf32, #tpu.memory_space<vmem>>, %arg9: memref<64x4xf32, #tpu.memory_space<vmem>>, %arg10: memref<64x1xf32, #tpu.memory_space<vmem>>, %arg11: memref<1x64x256xf32, #tpu.memory_space<vmem>>) attributes {dimension_semantics = [#tpu.dimension_semantics<parallel>], iteration_bounds = array<i64: 2>, scalar_prefetch = 0 : i64, scratch_operands = 0 : i64, tpu.core_type = #tpu.core_type<tc>, window_params = [{transform_indices = @transform_0, window_bounds = array<i64: 1>}, {transform_indices = @transform_1, window_bounds = array<i64: 18>}, {transform_indices = @transform_2, window_bounds = array<i64: 1, 64, 256>}, {pipeline_mode = #tpu.pipeline_mode<synchronous>, transform_indices = @transform_3, window_bounds = array<i64: 1, 256>}, {pipeline_mode = #tpu.pipeline_mode<synchronous>, transform_indices = @transform_4, window_bounds = array<i64: 1, 256>}, {pipeline_mode = #tpu.pipeline_mode<synchronous>, transform_indices = @transform_5, window_bounds = array<i64: 4, 64>}, {pipeline_mode = #tpu.pipeline_mode<synchronous>, transform_indices = @transform_6, window_bounds = array<i64: 4, 1>}, {pipeline_mode = #tpu.pipeline_mode<synchronous>, transform_indices = @transform_7, window_bounds = array<i64: 4, 1>}, {pipeline_mode = #tpu.pipeline_mode<synchronous>, transform_indices = @transform_8, window_bounds = array<i64: 64, 4>}, {pipeline_mode = #tpu.pipeline_mode<synchronous>, transform_indices = @transform_9, window_bounds = array<i64: 64, 1>}, {transform_indices = @transform_10, window_bounds = array<i64: 1, 64, 256>}]} {
    %c0 = arith.constant 0 : index
    %0 = memref.load %arg1[%c0] : memref<1xf32, #tpu.memory_space<smem>>
    %c0_0 = arith.constant 0 : index
    %c0_1 = arith.constant 0 : index
    %1 = vector.load %arg4[%c0_0, %c0_1] : memref<1x256xi32, #tpu.memory_space<vmem>>, vector<1x256xi32>
    %c0_2 = arith.constant 0 : index
    %c0_3 = arith.constant 0 : index
    %2 = vector.load %arg5[%c0_2, %c0_3] : memref<1x256xi32, #tpu.memory_space<vmem>>, vector<1x256xi32>
    %c1_i32 = arith.constant 1 : i32
    %3 = vector.broadcast %c1_i32 : i32 to vector<1x256xi32>
    %4 = arith.cmpi sge, %1, %3 : vector<1x256xi32>
    %c1_i32_4 = arith.constant 1 : i32
    %5 = vector.broadcast %c1_i32_4 : i32 to vector<1x256xi32>
    %6 = arith.cmpi sge, %2, %5 : vector<1x256xi32>
    %7 = arith.andi %4, %6 : vector<1x256xi1>
    %c0_5 = arith.constant 0 : index
    %8 = memref.load %arg2[%c0_5] : memref<18xf32, #tpu.memory_space<smem>>
    %c9 = arith.constant 9 : index
    %9 = memref.load %arg2[%c9] : memref<18xf32, #tpu.memory_space<smem>>
    %c1 = arith.constant 1 : index
    %10 = memref.load %arg2[%c1] : memref<18xf32, #tpu.memory_space<smem>>
    %c10 = arith.constant 10 : index
    %11 = memref.load %arg2[%c10] : memref<18xf32, #tpu.memory_space<smem>>
    %c14_i32 = arith.constant 14 : i32
    %12 = vector.broadcast %c14_i32 : i32 to vector<1x256xi32>
    %13 = arith.cmpi sle, %2, %12 : vector<1x256xi32>
    %14 = arith.andi %4, %13 : vector<1x256xi1>
    %c2 = arith.constant 2 : index
    %15 = memref.load %arg2[%c2] : memref<18xf32, #tpu.memory_space<smem>>
    %c11 = arith.constant 11 : index
    %16 = memref.load %arg2[%c11] : memref<18xf32, #tpu.memory_space<smem>>
    %c1_i32_6 = arith.constant 1 : i32
    %17 = vector.broadcast %c1_i32_6 : i32 to vector<1x256xi32>
    %18 = arith.cmpi sge, %2, %17 : vector<1x256xi32>
    %c3 = arith.constant 3 : index
    %19 = memref.load %arg2[%c3] : memref<18xf32, #tpu.memory_space<smem>>
    %c12 = arith.constant 12 : index
    %20 = memref.load %arg2[%c12] : memref<18xf32, #tpu.memory_space<smem>>
    %c4 = arith.constant 4 : index
    %21 = memref.load %arg2[%c4] : memref<18xf32, #tpu.memory_space<smem>>
    %c13 = arith.constant 13 : index
    %22 = memref.load %arg2[%c13] : memref<18xf32, #tpu.memory_space<smem>>
    %c14_i32_7 = arith.constant 14 : i32
    %23 = vector.broadcast %c14_i32_7 : i32 to vector<1x256xi32>
    %24 = arith.cmpi sle, %2, %23 : vector<1x256xi32>
    %c5 = arith.constant 5 : index
    %25 = memref.load %arg2[%c5] : memref<18xf32, #tpu.memory_space<smem>>
    %c14 = arith.constant 14 : index
    %26 = memref.load %arg2[%c14] : memref<18xf32, #tpu.memory_space<smem>>
    %c14_i32_8 = arith.constant 14 : i32
    %27 = vector.broadcast %c14_i32_8 : i32 to vector<1x256xi32>
    %28 = arith.cmpi sle, %1, %27 : vector<1x256xi32>
    %c1_i32_9 = arith.constant 1 : i32
    %29 = vector.broadcast %c1_i32_9 : i32 to vector<1x256xi32>
    %30 = arith.cmpi sge, %2, %29 : vector<1x256xi32>
    %31 = arith.andi %28, %30 : vector<1x256xi1>
    %c6 = arith.constant 6 : index
    %32 = memref.load %arg2[%c6] : memref<18xf32, #tpu.memory_space<smem>>
    %c15 = arith.constant 15 : index
    %33 = memref.load %arg2[%c15] : memref<18xf32, #tpu.memory_space<smem>>
    %c7 = arith.constant 7 : index
    %34 = memref.load %arg2[%c7] : memref<18xf32, #tpu.memory_space<smem>>
    %c16 = arith.constant 16 : index
    %35 = memref.load %arg2[%c16] : memref<18xf32, #tpu.memory_space<smem>>
    %c14_i32_10 = arith.constant 14 : i32
    %36 = vector.broadcast %c14_i32_10 : i32 to vector<1x256xi32>
    %37 = arith.cmpi sle, %2, %36 : vector<1x256xi32>
    %38 = arith.andi %28, %37 : vector<1x256xi1>
    %c8 = arith.constant 8 : index
    %39 = memref.load %arg2[%c8] : memref<18xf32, #tpu.memory_space<smem>>
    %c17 = arith.constant 17 : index
    %40 = memref.load %arg2[%c17] : memref<18xf32, #tpu.memory_space<smem>>
    %c0_11 = arith.constant 0 : index
    %c0_12 = arith.constant 0 : index
    %c0_13 = arith.constant 0 : index
    %41 = vector.load %arg3[%c0_11, %c0_12, %c0_13] : memref<1x64x256xf32, #tpu.memory_space<vmem>>, vector<1x64x256xf32>
    %42 = vector.shape_cast %41 : vector<1x64x256xf32> to vector<64x256xf32>
    %cst = arith.constant dense<0.000000e+00> : vector<64xf32>
    %43 = vector.multi_reduction <add>, %42, %cst [1] : vector<64x256xf32> to vector<64xf32>
    %44 = vector.shape_cast %43 : vector<64xf32> to vector<64x1xf32>
    %cst_14 = arith.constant 3.906250e-03 : f32
    %45 = vector.broadcast %cst_14 : f32 to vector<64x1xf32>
    %46 = arith.mulf %44, %45 : vector<64x1xf32>
    %c0_15 = arith.constant 0 : index
    %c0_16 = arith.constant 0 : index
    %47 = vector.load %arg6[%c0_15, %c0_16] : memref<4x64xf32, #tpu.memory_space<vmem>>, vector<4x64xf32>
    %cst_17 = arith.constant dense<0.000000e+00> : vector<4x1xf32>
    %48 = tpu.matmul %47, %46, %cst_17 {dimension_numbers = #tpu.dot_dimension_numbers<[1], [0], [0], [1], [0, 0, 1, 1], [], []>} : vector<4x64xf32>, vector<64x1xf32>, vector<4x1xf32> -> vector<4x1xf32>
    %c0_18 = arith.constant 0 : index
    %c0_19 = arith.constant 0 : index
    %49 = vector.load %arg7[%c0_18, %c0_19] : memref<4x1xf32, #tpu.memory_space<vmem>>, vector<4x1xf32>
    %50 = vector.broadcast %0 : f32 to vector<4x1xf32>
    %51 = arith.mulf %50, %49 : vector<4x1xf32>
    %52 = arith.addf %48, %51 : vector<4x1xf32>
    %c0_20 = arith.constant 0 : index
    %c0_21 = arith.constant 0 : index
    %53 = vector.load %arg8[%c0_20, %c0_21] : memref<4x1xf32, #tpu.memory_space<vmem>>, vector<4x1xf32>
    %54 = arith.addf %52, %53 : vector<4x1xf32>
    %cst_22 = arith.constant 0.000000e+00 : f32
    %55 = vector.broadcast %cst_22 : f32 to vector<4x1xf32>
    %56 = arith.maximumf %54, %55 : vector<4x1xf32>
    %c0_23 = arith.constant 0 : index
    %c0_24 = arith.constant 0 : index
    %57 = vector.load %arg9[%c0_23, %c0_24] : memref<64x4xf32, #tpu.memory_space<vmem>>, vector<64x4xf32>
    %cst_25 = arith.constant dense<0.000000e+00> : vector<64x1xf32>
    %58 = tpu.matmul %57, %56, %cst_25 {dimension_numbers = #tpu.dot_dimension_numbers<[1], [0], [0], [1], [0, 0, 1, 1], [], []>} : vector<64x4xf32>, vector<4x1xf32>, vector<64x1xf32> -> vector<64x1xf32>
    %c0_26 = arith.constant 0 : index
    %c0_27 = arith.constant 0 : index
    %59 = vector.load %arg10[%c0_26, %c0_27] : memref<64x1xf32, #tpu.memory_space<vmem>>, vector<64x1xf32>
    %60 = arith.addf %58, %59 : vector<64x1xf32>
    %61 = arith.negf %60 : vector<64x1xf32>
    %62 = math.exp %61 : vector<64x1xf32>
    %cst_28 = arith.constant 1.000000e+00 : f32
    %63 = vector.broadcast %cst_28 : f32 to vector<64x1xf32>
    %64 = arith.addf %63, %62 : vector<64x1xf32>
    %65 = arith.divf %63, %64 : vector<64x1xf32>
    %66 = vector.broadcast %65 : vector<64x1xf32> to vector<64x256xf32>
    %67 = arith.mulf %42, %66 : vector<64x256xf32>
    %cst_29 = arith.constant dense<0.000000e+00> : vector<256xf32>
    %68 = vector.multi_reduction <add>, %67, %cst_29 [0] : vector<64x256xf32> to vector<256xf32>
    %69 = vector.shape_cast %68 : vector<256xf32> to vector<1x256xf32>
    %cst_30 = arith.constant 1.562500e-02 : f32
    %70 = vector.broadcast %cst_30 : f32 to vector<1x256xf32>
    %71 = arith.mulf %69, %70 : vector<1x256xf32>
    %cst_31 = arith.constant dense<0xFF800000> : vector<256xf32>
    %72 = vector.multi_reduction <maximumf>, %67, %cst_31 [0] : vector<64x256xf32> to vector<256xf32>
    %73 = vector.shape_cast %72 : vector<256xf32> to vector<1x256xf32>
    %74 = tpu.concatenate %71, %73 in 0 : vector<1x256xf32>, vector<1x256xf32> -> vector<2x256xf32>
    %cst_32 = arith.constant 0.000000e+00 : f32
    %75 = vector.broadcast %cst_32 : f32 to vector<1x256xf32>
    %c17_i32 = arith.constant 17 : i32
    %76 = tpu.dynamic_rotate %74 by %c17_i32 dim 1 : vector<2x256xf32>, i32 -> vector<2x256xf32>
    %77 = vector.extract_strided_slice %76 {offsets = [0, 0], sizes = [1, 256], strides = [1, 1]} : vector<2x256xf32> to vector<1x256xf32>
    %78 = vector.broadcast %8 : f32 to vector<1x256xf32>
    %79 = arith.mulf %78, %77 : vector<1x256xf32>
    %80 = vector.extract_strided_slice %76 {offsets = [1, 0], sizes = [1, 256], strides = [1, 1]} : vector<2x256xf32> to vector<1x256xf32>
    %81 = vector.broadcast %9 : f32 to vector<1x256xf32>
    %82 = arith.mulf %81, %80 : vector<1x256xf32>
    %83 = arith.addf %79, %82 : vector<1x256xf32>
    %cst_33 = arith.constant 0.000000e+00 : f32
    %84 = vector.broadcast %cst_33 : f32 to vector<1x256xf32>
    %85 = arith.select %7, %83, %84 : vector<1x256xi1>, vector<1x256xf32>
    %86 = arith.addf %75, %85 : vector<1x256xf32>
    %c16_i32 = arith.constant 16 : i32
    %87 = tpu.dynamic_rotate %74 by %c16_i32 dim 1 : vector<2x256xf32>, i32 -> vector<2x256xf32>
    %88 = vector.extract_strided_slice %87 {offsets = [0, 0], sizes = [1, 256], strides = [1, 1]} : vector<2x256xf32> to vector<1x256xf32>
    %89 = vector.broadcast %10 : f32 to vector<1x256xf32>
    %90 = arith.mulf %89, %88 : vector<1x256xf32>
    %91 = vector.extract_strided_slice %87 {offsets = [1, 0], sizes = [1, 256], strides = [1, 1]} : vector<2x256xf32> to vector<1x256xf32>
    %92 = vector.broadcast %11 : f32 to vector<1x256xf32>
    %93 = arith.mulf %92, %91 : vector<1x256xf32>
    %94 = arith.addf %90, %93 : vector<1x256xf32>
    %cst_34 = arith.constant 0.000000e+00 : f32
    %95 = vector.broadcast %cst_34 : f32 to vector<1x256xf32>
    %96 = arith.select %4, %94, %95 : vector<1x256xi1>, vector<1x256xf32>
    %97 = arith.addf %86, %96 : vector<1x256xf32>
    %c15_i32 = arith.constant 15 : i32
    %98 = tpu.dynamic_rotate %74 by %c15_i32 dim 1 : vector<2x256xf32>, i32 -> vector<2x256xf32>
    %99 = vector.extract_strided_slice %98 {offsets = [0, 0], sizes = [1, 256], strides = [1, 1]} : vector<2x256xf32> to vector<1x256xf32>
    %100 = vector.broadcast %15 : f32 to vector<1x256xf32>
    %101 = arith.mulf %100, %99 : vector<1x256xf32>
    %102 = vector.extract_strided_slice %98 {offsets = [1, 0], sizes = [1, 256], strides = [1, 1]} : vector<2x256xf32> to vector<1x256xf32>
    %103 = vector.broadcast %16 : f32 to vector<1x256xf32>
    %104 = arith.mulf %103, %102 : vector<1x256xf32>
    %105 = arith.addf %101, %104 : vector<1x256xf32>
    %cst_35 = arith.constant 0.000000e+00 : f32
    %106 = vector.broadcast %cst_35 : f32 to vector<1x256xf32>
    %107 = arith.select %14, %105, %106 : vector<1x256xi1>, vector<1x256xf32>
    %108 = arith.addf %97, %107 : vector<1x256xf32>
    %c1_i32_36 = arith.constant 1 : i32
    %109 = tpu.dynamic_rotate %74 by %c1_i32_36 dim 1 : vector<2x256xf32>, i32 -> vector<2x256xf32>
    %110 = vector.extract_strided_slice %109 {offsets = [0, 0], sizes = [1, 256], strides = [1, 1]} : vector<2x256xf32> to vector<1x256xf32>
    %111 = vector.broadcast %19 : f32 to vector<1x256xf32>
    %112 = arith.mulf %111, %110 : vector<1x256xf32>
    %113 = vector.extract_strided_slice %109 {offsets = [1, 0], sizes = [1, 256], strides = [1, 1]} : vector<2x256xf32> to vector<1x256xf32>
    %114 = vector.broadcast %20 : f32 to vector<1x256xf32>
    %115 = arith.mulf %114, %113 : vector<1x256xf32>
    %116 = arith.addf %112, %115 : vector<1x256xf32>
    %cst_37 = arith.constant 0.000000e+00 : f32
    %117 = vector.broadcast %cst_37 : f32 to vector<1x256xf32>
    %118 = arith.select %18, %116, %117 : vector<1x256xi1>, vector<1x256xf32>
    %119 = arith.addf %108, %118 : vector<1x256xf32>
    %120 = vector.extract_strided_slice %74 {offsets = [0, 0], sizes = [1, 256], strides = [1, 1]} : vector<2x256xf32> to vector<1x256xf32>
    %121 = vector.broadcast %21 : f32 to vector<1x256xf32>
    %122 = arith.mulf %121, %120 : vector<1x256xf32>
    %123 = vector.extract_strided_slice %74 {offsets = [1, 0], sizes = [1, 256], strides = [1, 1]} : vector<2x256xf32> to vector<1x256xf32>
    %124 = vector.broadcast %22 : f32 to vector<1x256xf32>
    %125 = arith.mulf %124, %123 : vector<1x256xf32>
    %126 = arith.addf %122, %125 : vector<1x256xf32>
    %127 = arith.addf %119, %126 : vector<1x256xf32>
    %c255_i32 = arith.constant 255 : i32
    %128 = tpu.dynamic_rotate %74 by %c255_i32 dim 1 : vector<2x256xf32>, i32 -> vector<2x256xf32>
    %129 = vector.extract_strided_slice %128 {offsets = [0, 0], sizes = [1, 256], strides = [1, 1]} : vector<2x256xf32> to vector<1x256xf32>
    %130 = vector.broadcast %25 : f32 to vector<1x256xf32>
    %131 = arith.mulf %130, %129 : vector<1x256xf32>
    %132 = vector.extract_strided_slice %128 {offsets = [1, 0], sizes = [1, 256], strides = [1, 1]} : vector<2x256xf32> to vector<1x256xf32>
    %133 = vector.broadcast %26 : f32 to vector<1x256xf32>
    %134 = arith.mulf %133, %132 : vector<1x256xf32>
    %135 = arith.addf %131, %134 : vector<1x256xf32>
    %cst_38 = arith.constant 0.000000e+00 : f32
    %136 = vector.broadcast %cst_38 : f32 to vector<1x256xf32>
    %137 = arith.select %24, %135, %136 : vector<1x256xi1>, vector<1x256xf32>
    %138 = arith.addf %127, %137 : vector<1x256xf32>
    %c241_i32 = arith.constant 241 : i32
    %139 = tpu.dynamic_rotate %74 by %c241_i32 dim 1 : vector<2x256xf32>, i32 -> vector<2x256xf32>
    %140 = vector.extract_strided_slice %139 {offsets = [0, 0], sizes = [1, 256], strides = [1, 1]} : vector<2x256xf32> to vector<1x256xf32>
    %141 = vector.broadcast %32 : f32 to vector<1x256xf32>
    %142 = arith.mulf %141, %140 : vector<1x256xf32>
    %143 = vector.extract_strided_slice %139 {offsets = [1, 0], sizes = [1, 256], strides = [1, 1]} : vector<2x256xf32> to vector<1x256xf32>
    %144 = vector.broadcast %33 : f32 to vector<1x256xf32>
    %145 = arith.mulf %144, %143 : vector<1x256xf32>
    %146 = arith.addf %142, %145 : vector<1x256xf32>
    %cst_39 = arith.constant 0.000000e+00 : f32
    %147 = vector.broadcast %cst_39 : f32 to vector<1x256xf32>
    %148 = arith.select %31, %146, %147 : vector<1x256xi1>, vector<1x256xf32>
    %149 = arith.addf %138, %148 : vector<1x256xf32>
    %c240_i32 = arith.constant 240 : i32
    %150 = tpu.dynamic_rotate %74 by %c240_i32 dim 1 : vector<2x256xf32>, i32 -> vector<2x256xf32>
    %151 = vector.extract_strided_slice %150 {offsets = [0, 0], sizes = [1, 256], strides = [1, 1]} : vector<2x256xf32> to vector<1x256xf32>
    %152 = vector.broadcast %34 : f32 to vector<1x256xf32>
    %153 = arith.mulf %152, %151 : vector<1x256xf32>
    %154 = vector.extract_strided_slice %150 {offsets = [1, 0], sizes = [1, 256], strides = [1, 1]} : vector<2x256xf32> to vector<1x256xf32>
    %155 = vector.broadcast %35 : f32 to vector<1x256xf32>
    %156 = arith.mulf %155, %154 : vector<1x256xf32>
    %157 = arith.addf %153, %156 : vector<1x256xf32>
    %cst_40 = arith.constant 0.000000e+00 : f32
    %158 = vector.broadcast %cst_40 : f32 to vector<1x256xf32>
    %159 = arith.select %28, %157, %158 : vector<1x256xi1>, vector<1x256xf32>
    %160 = arith.addf %149, %159 : vector<1x256xf32>
    %c239_i32 = arith.constant 239 : i32
    %161 = tpu.dynamic_rotate %74 by %c239_i32 dim 1 : vector<2x256xf32>, i32 -> vector<2x256xf32>
    %162 = vector.extract_strided_slice %161 {offsets = [0, 0], sizes = [1, 256], strides = [1, 1]} : vector<2x256xf32> to vector<1x256xf32>
    %163 = vector.broadcast %39 : f32 to vector<1x256xf32>
    %164 = arith.mulf %163, %162 : vector<1x256xf32>
    %165 = vector.extract_strided_slice %161 {offsets = [1, 0], sizes = [1, 256], strides = [1, 1]} : vector<2x256xf32> to vector<1x256xf32>
    %166 = vector.broadcast %40 : f32 to vector<1x256xf32>
    %167 = arith.mulf %166, %165 : vector<1x256xf32>
    %168 = arith.addf %164, %167 : vector<1x256xf32>
    %cst_41 = arith.constant 0.000000e+00 : f32
    %169 = vector.broadcast %cst_41 : f32 to vector<1x256xf32>
    %170 = arith.select %38, %168, %169 : vector<1x256xi1>, vector<1x256xf32>
    %171 = arith.addf %160, %170 : vector<1x256xf32>
    %172 = arith.negf %171 : vector<1x256xf32>
    %173 = math.exp %172 : vector<1x256xf32>
    %cst_42 = arith.constant 1.000000e+00 : f32
    %174 = vector.broadcast %cst_42 : f32 to vector<1x256xf32>
    %175 = arith.addf %174, %173 : vector<1x256xf32>
    %176 = arith.divf %174, %175 : vector<1x256xf32>
    %177 = vector.broadcast %65 : vector<64x1xf32> to vector<64x256xf32>
    %178 = arith.mulf %42, %177 : vector<64x256xf32>
    %179 = vector.broadcast %176 : vector<1x256xf32> to vector<64x256xf32>
    %180 = arith.mulf %178, %179 : vector<64x256xf32>
    %c0_43 = arith.constant 0 : index
    %c0_44 = arith.constant 0 : index
    %c0_45 = arith.constant 0 : index
    %181 = vector.load %arg11[%c0_43, %c0_44, %c0_45] : memref<1x64x256xf32, #tpu.memory_space<vmem>>, vector<1x64x256xf32>
    %182 = vector.shape_cast %181 : vector<1x64x256xf32> to vector<64x256xf32>
    %183 = vector.shape_cast %180 : vector<64x256xf32> to vector<1x64x256xf32>
    tpu.vector_store %arg11[%c0_43, %c0_44, %c0_45], %183 {strides = array<i32>} : memref<1x64x256xf32, #tpu.memory_space<vmem>>, vector<1x64x256xf32>,
    return
  }
  func.func @transform_0(%arg0: i32) -> i32 {
    %c0_i32 = arith.constant 0 : i32
    %c0_i32_0 = arith.constant 0 : i32
    return %c0_i32 : i32
  }
  func.func @transform_1(%arg0: i32) -> i32 {
    %c0_i32 = arith.constant 0 : i32
    %c0_i32_0 = arith.constant 0 : i32
    return %c0_i32 : i32
  }
  func.func @transform_2(%arg0: i32) -> (i32, i32, i32) {
    %c0_i32 = arith.constant 0 : i32
    %c0_i32_0 = arith.constant 0 : i32
    %c0_i32_1 = arith.constant 0 : i32
    return %arg0, %c0_i32, %c0_i32_0 : i32, i32, i32
  }
  func.func @transform_3(%arg0: i32) -> (i32, i32) {
    %c0_i32 = arith.constant 0 : i32
    %c0_i32_0 = arith.constant 0 : i32
    %c0_i32_1 = arith.constant 0 : i32
    return %c0_i32, %c0_i32_0 : i32, i32
  }
  func.func @transform_4(%arg0: i32) -> (i32, i32) {
    %c0_i32 = arith.constant 0 : i32
    %c0_i32_0 = arith.constant 0 : i32
    %c0_i32_1 = arith.constant 0 : i32
    return %c0_i32, %c0_i32_0 : i32, i32
  }
  func.func @transform_5(%arg0: i32) -> (i32, i32) {
    %c0_i32 = arith.constant 0 : i32
    %c0_i32_0 = arith.constant 0 : i32
    %c0_i32_1 = arith.constant 0 : i32
    return %c0_i32, %c0_i32_0 : i32, i32
  }
  func.func @transform_6(%arg0: i32) -> (i32, i32) {
    %c0_i32 = arith.constant 0 : i32
    %c0_i32_0 = arith.constant 0 : i32
    %c0_i32_1 = arith.constant 0 : i32
    return %c0_i32, %c0_i32_0 : i32, i32
  }
  func.func @transform_7(%arg0: i32) -> (i32, i32) {
    %c0_i32 = arith.constant 0 : i32
    %c0_i32_0 = arith.constant 0 : i32
    %c0_i32_1 = arith.constant 0 : i32
    return %c0_i32, %c0_i32_0 : i32, i32
  }
  func.func @transform_8(%arg0: i32) -> (i32, i32) {
    %c0_i32 = arith.constant 0 : i32
    %c0_i32_0 = arith.constant 0 : i32
    %c0_i32_1 = arith.constant 0 : i32
    return %c0_i32, %c0_i32_0 : i32, i32
  }
  func.func @transform_9(%arg0: i32) -> (i32, i32) {
    %c0_i32 = arith.constant 0 : i32
    %c0_i32_0 = arith.constant 0 : i32
    %c0_i32_1 = arith.constant 0 : i32
    return %c0_i32, %c0_i32_0 : i32, i32
  }
  func.func @transform_10(%arg0: i32) -> (i32, i32, i32) {
    %c0_i32 = arith.constant 0 : i32
    %c0_i32_0 = arith.constant 0 : i32
    %c0_i32_1 = arith.constant 0 : i32
    return %arg0, %c0_i32, %c0_i32_0 : i32, i32, i32
  }
}

</mosaic_0001>

<bundles_post_ra>
// kernel: tpu_custom_call.1
= control target key start
LH: loop header
LB: loop body
LE: loop exit
PB: predicated region body
PF: predicated region fallthrough
CT: control target
= control target key end

     0   :  { %s2380_s0 = inlined_call_operand.<no memory space> [shape: f32[1], index: 0, kind: input, shape index: {}]   ;;  %s2381_s1 = inlined_call_operand.vmem [shape: f32[18], index: 1, kind: input, shape index: {}]   ;;  %s2382_s2 = inlined_call_operand.hbm [shape: f32[2,64,256], index: 2, kind: input, shape index: {}]   ;;  %s2383_s3 = inlined_call_operand.vmem [shape: s32[1,256], index: 3, kind: input, shape index: {}]   ;;  %s2384_s4 = inlined_call_operand.vmem [shape: s32[1,256], index: 4, kind: input, shape index: {}]   ;;  %s2385_s5 = inlined_call_operand.vmem [shape: f32[4,64], index: 5, kind: input, shape index: {}]   ;;  %s2386_s6 = inlined_call_operand.vmem [shape: f32[4,1], index: 6, kind: input, shape index: {}]   ;;  %s2387_s7 = inlined_call_operand.vmem [shape: f32[4,1], index: 7, kind: input, shape index: {}]   ;;  %s2388_s8 = inlined_call_operand.vmem [shape: f32[64,4], index: 8, kind: input, shape index: {}]   ;;  %s2389_s9 = inlined_call_operand.vmem [shape: f32[64,1], index: 9, kind: input, shape index: {}]   ;;  %s2390_s10 = inlined_call_operand.hbm [shape: f32[2,64,256], index: 10, kind: output, shape index: {}]  }
   0x1   :  { %2396 = sst [smem:[#allocation14_spill]] %s2381_s1 }
   0x2   :  { %15 = sst [smem:[#allocation2]] %s2380_s0 }
   0x3   :  { %16 = vsyncpa [#allocation6], 0 }
   0x4   :  { %17 = vsyncpa [#allocation4], 0 }
   0x5   :  { %19 = vsyncpa [#allocation4 + $0x1], 0 }
   0x6   :  { %20 = vsyncpa [#allocation5], 0 }
   0x7   :  { %22 = vsyncpa [#allocation5 + $0x1], 0  ;;  %s1795_s15 = smov 0   ;;  %s1797_s16 = smov 0  }
   0x8   :  { %s1799_s17 = smov 0   ;;  %s1801_s18 = smov 0  }
   0x9 LB: > { %2397 = sst [smem:[#allocation12_spill]] %s1712_s17  ;;  %s1816_s0 = sadd.s32 4294967295, %s1716_s18   ;;  %s1716_s18 = sphi %s1801_s18, %s2418_s18   ;;  %s1712_s17 = sphi %s1799_s17, %s2415_s17   ;;  %s1708_s16 = sphi %s1797_s16, %s2417_s16   ;;  %s1704_s15 = sphi %s1795_s15, %s2416_s15  }
   0xa   : > { %s1373_s19 = sadd.s32 4294967294, %s1716_s18   ;;  %s1820_s20 = sadd.s32 1, %s1716_s18  }
   0xb   : > { %s77_s21 = sadd.s32 1, %s1712_s17  ;;  %s74_s22 = ssub.s32 %s1716_s18, %s1820_s20 }
   0xc   : > { %p84_p0 = scmp.ne.s32.totalorder %s1712_s17, %s1708_s16  ;;  %p75_p1 = scmp.eq.s32.totalorder %s74_s22, 0 }
   0xd   : > { %p85_p2 = scmp.eq.s32.totalorder %s1716_s18, 0  ;;  %p90_p3 = scmp.ne.s32.totalorder %s1708_s16, %s1704_s15 }
   0xe   : > { %p2392_p4 = scmp.eq.s32.totalorder %s1816_s0, 0  ;;  %p261_p7 = scmp.eq.s32.totalorder %s1816_s0, 1 }
   0xf   : > { %s1832_s23 = scalar_select %p75_p1, %s1712_s17, %s77_s21  }
  0x10   : > { %p1834_p5 = por %p85_p2, %p84_p0  ;;  %p1840_p6 = por %p2392_p4, %p90_p3 }
  0x11   : > { %2398 = sst [smem:[#allocation13_spill]] %s1832_s23  ;;  %p267_p8 = scmp.eq.s32.totalorder %s1373_s19, 1 }
  0x12   : > { %s2400_s25 = scalar_select %p1840_p6, 1, 0 }
  0x13   : > { %p1374_p9 = scmp.ge.s32.totalorder %s1716_s18, 1  ;;  %p274_p10 = scmp.lt.s32.totalorder %s1716_s18, 3 }
  0x14   : > { %p1847_p11 = por %p261_p7, %p84_p0  ;;  %p1851_p12 = por %p267_p8, %p90_p3 }
  0x15   : > { %p1855_p13 = pnand %p1374_p9, %p274_p10  ;;  %s2404_s1 = sld [smem:[#allocation14_spill]] }
  0x16   : > { %s2401_s26 = scalar_select %p1847_p11, 1, 0 }
  0x17   : > { %s2402_s27 = scalar_select %p1851_p12, 1, 0 }
  0x18   : > { %p1498_p1 = pneg %p1855_p13  ;;  %p1511_p2 = scmp.lt.s32.totalorder %s1716_s18, 2 }
  0x19   : > { %s322_s13 = sand.u32 1, %s1712_s17  }
  0x1a   : > { %p1868_p7 = pnand %p1498_p1, %p2392_p4  ;;  %p1875_p3 = pnand %p1511_p2, %p1834_p5 }
  0x1b   : > { %s290_s11 = sshll.u32 %s2404_s1, 4  ;;  %s1377_s19 = sshll.u32 %s322_s13, 7  ;;  %s291_s11 = int_to_ptr.vmem [resolvable:$true] %s290_s11 }
  0x1c   : > { %s1601_s21 = scalar_lea.vmem %s291_s11, 16  ;;  %p1603_p9 = pneg %p1868_p7 }
  0x1d   : > { %p1602_p8 = scmp.ne.s32.totalorder %s291_s11, %s1601_s21  ;;  %p1609_p12 = scmp.lt.s32.totalorder %s291_s11, %s291_s11 }
  0x1e   : > { %p1610_p11 = scmp.lt.s32.totalorder %s1601_s21, %s1601_s21 }
  0x1f   : > { %p1604_p10 = pnand %p1603_p9, %p1602_p8 }
  0x20   : > { %p1611_p1 = por %p1610_p11, %p1609_p12 }
  0x21   : > { %p1605_p0 = pneg %p1604_p10 }
  0x23   : > { %p1612_p4 = pnand %p1611_p1, %p1605_p0 }
  0x25   : > { %1615 = shalt.err (!%p1612_p4)
}
  0x26   : > { %s1718_s22 = smov [#allocation3]   ;;  %s1425_s24 = sshll.u32 %s1716_s18, 11 }
  0x27   : > { %1501 = dma.vmem_to_smem (!%p1868_p7), %s291_s11, 16, %s1718_s22, [#allocation6]  }
  0x28   : > { %s326_s29 = scalar_lea.vmem [#allocation7], %s1377_s19  ;;  %s1887_s17 = scalar_lea.hbm %s2382_s2, %s1425_s24 }
  0x29   : > { %s333_s30 = sshll.u32 %s326_s29, 4  ;;  %s1891_s21 = scalar_lea.sflag [#allocation4], %s322_s13  ;;  %s1889_s30 = int_to_ptr.vmem [resolvable:$true] %s333_s30 }
  0x2a   : > { %s1616_s12 = scalar_lea.hbm %s1887_s17, 2048  ;;  %p1618_p5 = pneg %p1875_p3 }
  0x2b   : > { %p1617_p4 = scmp.ne.s32.totalorder %s1887_s17, %s1616_s12  ;;  %s1621_s23 = scalar_lea.hbm %s2382_s2, 4096 }
  0x2c   : > { %p1622_p0 = scmp.lt.u32.totalorder %s1887_s17, %s2382_s2  ;;  %p1623_p2 = scmp.lt.u32.totalorder %s1621_s23, %s1616_s12 }
  0x2d   : > { %p1619_p11 = pnand %p1618_p5, %p1617_p4  ;;  %p1625_p8 = scmp.lt.u32.totalorder %s1616_s12, %s1887_s17 }
  0x2e   : > { %p1624_p7 = por %p1623_p2, %p1622_p0 }
  0x2f   : > { %p1620_p12 = pneg %p1619_p11 }
  0x30   : > { %p1626_p9 = por %p1625_p8, %p1624_p7 }
  0x32   : > { %p1627_p10 = pnand %p1626_p9, %p1620_p12 }
  0x34   : > { %1630 = shalt.err (!%p1627_p10)
}
  0x35   : > { %s1631_s13 = scalar_lea.vmem %s1889_s30, 2048  ;;  %s1719_s24 = smov [#allocation7]  }
  0x36   : > { %p1632_p1 = scmp.ne.s32.totalorder %s1889_s30, %s1631_s13  ;;  %s1636_s29 = sshll.u32 %s1719_s24, 4  ;;  %s1637_s29 = int_to_ptr.vmem [resolvable:$false] %s1636_s29 }
  0x37   : > { %s1638_s11 = scalar_lea.vmem %s1637_s29, 4096  ;;  %p1639_p6 = scmp.lt.s32.totalorder %s1889_s30, %s1637_s29 }
  0x38   : > { %p1634_p4 = pnand %p1632_p1, %p1618_p5  ;;  %p1640_p0 = scmp.lt.s32.totalorder %s1638_s11, %s1631_s13 }
  0x3a   : > { %p1635_p11 = pneg %p1634_p4  ;;  %p1641_p2 = por %p1640_p0, %p1639_p6 }
  0x3c   : > { %p1642_p7 = pnand %p1641_p2, %p1635_p11 }
  0x3e   : > { %1645 = shalt.err (!%p1642_p7)
}
  0x3f   : > { %s1720_s12 = smov 256   ;;  %s1721_s1 = smov 16  }
  0x40   : > { %1505 = dma.hbm_to_vmem [thread:$0]  (!%p1875_p3), %s1887_s17, 2048, %s1889_s30, %s1891_s21, %s1720_s12, %s1720_s12, %s1721_s1  }
  0x41   : > { %345 = sbr.rel (%p1855_p13) target bundleno = 1091 (0x443), region = 60  ;;  %p2407_p5 = scmp.eq.s32.totalorder (!%p1855_p13), %s1816_s0, 0 }
  0x48   : > { %1691 = dma.done.wait (%p2407_p5), [#allocation6], 16   ;;  %p2408_p12 = pmov %p2407_p5 }
  0x49   : > { %s1926_s23 = sand.u32 1, %s1708_s16   ;;  %p2409_p6 = scmp.ne.s32.totalorder %s2400_s25, 0 }
  0x4a   : > { %1693 = vsyncadd (%p2408_p12), [#allocation6], 4294967280  ;;  %s1382_s19 = sshll.u32 %s1926_s23, 7  ;;  %s352_s22 = scalar_lea.sflag [#allocation4], %s1926_s23 }
  0x4b   : > { %s355_s17 = scalar_lea.vmem [#allocation7], %s1382_s19 }
  0x4c   : > { %1695 = dma.done.wait (%p2409_p6), %s352_s22, 2048  }
  0x4d   : > { %1697 = vsyncadd (%p2409_p6), %s352_s22, 4294965248 }
  0x4e   : > { %360 = sfence }
  0x4f   : > { %v1936_v0 = vld [vmem:[%s355_s17 + $0x20] sm:$0xff]  ;;  %v1938_v1 = vld [vmem:[%s355_s17 + $0x28] sm:$0xff]  ;;  %v1946_v5 = vld [vmem:[%s355_s17 + $0x30] sm:$0xff]  ;;  %v1722_v24 = vmov 0.0|0.0   ;;  %vm1723_vm0 = vmmov 0   ;;  %v1724_v25 = vmov 0.0  }
  0x50   : > { %v1940_v2 = vld [vmem:[%s355_s17] sm:$0xff]  ;;  %v444_v3 = vadd.f32 %v1938_v1, %v1936_v0  ;;  %v1944_v4 = vld [vmem:[%s355_s17 + $0x8] sm:$0xff]  ;;  %v1948_v6 = vld [vmem:[%s355_s17 + $0x38] sm:$0xff]  ;;  %1478 = vmatprep.subr.bf16.mxu0 %v1722_v24  ;;  %1461 = vmatprep.mubr.msk.f32.mxu0 %vm1723_vm0, %v1724_v25  ;;  %vm474_vm1 = vcmask 523264   ;;  %vm567_vm2 = vcmask 31744   ;;  %s393_s21 = sld [smem:[#allocation2]] }
  0x51   : > { %v438_v7 = vadd.f32 %v1944_v4, %v1940_v2  ;;  %v1952_v8 = vld [vmem:[%s355_s17 + $0x10] sm:$0xff]  ;;  %v1954_v9 = vld [vmem:[%s355_s17 + $0x18] sm:$0xff]  ;;  %v447_v10 = vadd.f32 %v1948_v6, %v1946_v5  ;;  %v1964_v14 = vld [vmem:[%s355_s17 + $0x40] sm:$0xff]  ;;  %vm592_vm3 = vcmask 1043456   ;;  %s2129_s25 = sld [smem:[#allocation3 + $0xd]]  ;;  %s1391_s28 = sld [smem:[#allocation3 + $0x4]] }
  0x52   : > { %445 = vadd.xlane.f32.xlu1 %v444_v3  ;;  %v441_v11 = vadd.f32 %v1954_v9, %v1952_v8  ;;  %v1960_v12 = vld [vmem:[%s355_s17 + $0x50] sm:$0xff]  ;;  %v1962_v13 = vld [vmem:[%s355_s17 + $0x58] sm:$0xff]  ;;  %v1966_v15 = vld [vmem:[%s355_s17 + $0x48] sm:$0xff]  ;;  %v1725_v3 = vmov 0   ;;  %vm859_vm4 = vcmask 1040384   ;;  %s1726_s14 = smov 17  }
  0x53   : > { %439 = vadd.xlane.f32.xlu0 %v438_v7  ;;  %v453_v16 = vadd.f32 %v1962_v13, %v1960_v12  ;;  %v450_v17 = vadd.f32 %v1966_v15, %v1964_v14  ;;  %v1972_v18 = vld [vmem:[%s355_s17 + $0x70] sm:$0xff]  ;;  %v1974_v19 = vld [vmem:[%s355_s17 + $0x78] sm:$0xff]  ;;  %v1976_v20 = vld [vmem:[%s355_s17 + $0x60] sm:$0xff]  ;;  %1564 = vset.pattern.permute.xlu1 %v1725_v3  ;;  %s2395_s30 = smov 16   ;;  %s1729_s13 = smov 1  }
  0x54   : > { %v1978_v21 = vld [vmem:[%s355_s17 + $0x68] sm:$0xff]  ;;  %v459_v22 = vadd.f32 %v1974_v19, %v1972_v18  ;;  %v470_v46 = vld [vmem:[%s2385_s5] sm:$0xf]  ;;  %v553_v58 = vld [vmem:[%s2388_s8 + $0x10] sm:$0xff]  ;;  %1563 = vset.pattern.permute.xlu0 %v1725_v3  ;;  %s1730_s24 = smov 127   ;;  %s1731_s29 = smov 113  }
  0x55   : > { %v456_v23 = vadd.f32 %v1978_v21, %v1976_v20  ;;  %v551_v47 = vld [vmem:[%s2388_s8] sm:$0xff]  ;;  %v552_v57 = vld [vmem:[%s2388_s8 + $0x8] sm:$0xff]  ;;  %v554_v59 = vld [vmem:[%s2388_s8 + $0x18] sm:$0xff]  ;;  %s1732_s11 = smov 112   ;;  %s1733_s12 = smov 111  }
  0x56   : > { %448 = vadd.xlane.f32.xlu1 %v447_v10  ;;  %1466 = vmatprep.mubr.msk.f32.mxu1 %vm567_vm2, %v551_v47  ;;  %v471_v48 = vld [vmem:[%s2386_s6] sm:$0xf]  ;;  %v472_v49 = vstv %s393_s21  ;;  %v556_v61 = vld [vmem:[%s2388_s8 + $0x28] sm:$0xff]  ;;  %v557_v62 = vld [vmem:[%s2388_s8 + $0x30] sm:$0xff]  ;;  %s1728_s21 = smov 15   ;;  %s1384_s1 = sld [smem:[#allocation3 + $0x9]] }
  0x57   : > { %442 = vadd.xlane.f32.xlu0 %v441_v11  ;;  %v473_v50 = vmul.f32 %v472_v49, %v471_v48  ;;  %v548_v52 = vld [vmem:[%s2387_s7] sm:$0xf]  ;;  %v558_v63 = vld [vmem:[%s2388_s8 + $0x38] sm:$0xff]  ;;  %v560_v7 = vld [vmem:[%s2389_s9 + $0x8] sm:$0xff]  ;;  %s2140_s22 = sld [smem:[#allocation3]]  ;;  %s2144_s17 = sld [smem:[#allocation3 + $0x1]] }
  0x58   : > { %v555_v60 = vld [vmem:[%s2388_s8 + $0x20] sm:$0xff]  ;;  %v561_v25 = vld [vmem:[%s2389_s9 + $0x10] sm:$0xff]  ;;  %p2410_p3 = scmp.ne.s32.totalorder %s2401_s26, 0 }
  0x59   : > { %v559_v10 = vld [vmem:[%s2389_s9] sm:$0xff] }
  0x5a   : > { %454 = vadd.xlane.f32.xlu1 %v453_v16 }
  0x5b   : > { %451 = vadd.xlane.f32.xlu0 %v450_v17 }
  0x5e   : > { %460 = vadd.xlane.f32.xlu1 %v459_v22 }
  0x5f   : > { %457 = vadd.xlane.f32.xlu0 %v456_v23  ;;  %v562_v23 = vld [vmem:[%s2389_s9 + $0x18] sm:$0xff] }
  0xdf   : > { %v446_v26 = vpop.xlane.xlu1 %445 }
  0xe0   : > { %v440_v27 = vpop.xlane.xlu0 %439  ;;  %v464_v32 = vmul.f32 0.00390625, %v446_v26 }
  0xe1   : > { %v462_v30 = vmul.f32 0.00390625, %v440_v27 }
  0xe3   : > { %v449_v28 = vpop.xlane.xlu1 %448 }
  0xe4   : > { %v443_v29 = vpop.xlane.xlu0 %442  ;;  %v465_v33 = vmul.f32 0.00390625, %v449_v28 }
  0xe5   : > { %v463_v31 = vmul.f32 0.00390625, %v443_v29 }
  0xe6   : > { %v1482_v39 = vpack.c.bf16 %v465_v33, %v464_v32  ;;  %v563_v33 = vld [vmem:[%s2389_s9 + $0x20] sm:$0xff] }
  0xe7   : > { %v1479_v34 = vpack.c.bf16 %v463_v31, %v462_v30  ;;  %v455_v35 = vpop.xlane.xlu1 %454  ;;  %v564_v31 = vld [vmem:[%s2389_s9 + $0x28] sm:$0xff] }
  0xe8   : > { %v452_v36 = vpop.xlane.xlu0 %451  ;;  %v467_v37 = vmul.f32 0.00390625, %v455_v35 }
  0xe9   : > { %1480 = vmatpush3.bf16.msra.mxu0 %v1479_v34  ;;  %v466_v38 = vmul.f32 0.00390625, %v452_v36 }
  0xea   : > { %1481 = vmatprep.subr.bf16.mxu0 %v1722_v24 }
  0xeb   : > { %v461_v40 = vpop.xlane.xlu1 %460  ;;  %v1485_v42 = vpack.c.bf16 %v467_v37, %v466_v38 }
  0xec   : > { %v458_v41 = vpop.xlane.xlu0 %457  ;;  %v469_v43 = vmul.f32 0.00390625, %v461_v40  ;;  %v565_v40 = vld [vmem:[%s2389_s9 + $0x30] sm:$0xff] }
  0xed   : > { %1483 = vmatpush3.bf16.msra.mxu0 %v1482_v39  ;;  %v468_v44 = vmul.f32 0.00390625, %v458_v41 }
  0xee   : > { %1484 = vmatprep.subr.bf16.mxu0 %v1722_v24 }
  0xef   : > { %v1488_v45 = vpack.c.bf16 %v469_v43, %v468_v44  ;;  %v566_v44 = vld [vmem:[%s2389_s9 + $0x38] sm:$0xff] }
  0xf1   : > { %1486 = vmatpush3.bf16.msra.mxu0 %v1485_v42 }
  0xf2   : > { %1487 = vmatprep.subr.bf16.mxu0 %v1722_v24 }
  0xf5   : > { %1489 = vmatpush3.bf16.msra.mxu0 %v1488_v45 }
  0xf8   : > { %1462 = vmatmul.mubr.msk.f32.vlgmr.msra.gmra.mrb[0].mxu0 %vm474_vm1, %v470_v46 }
 0x1cb   : > { %v544_v51 = vpop.f32.mrb[0].mxu0 }
 0x1cc   : > { %v545_v53 = vadd.f32 %v544_v51, %v473_v50  ;;  %v1463_v54 = vpop.f32.mrb[1].mxu0 }
 0x1ce   : > { %v549_v55 = vadd.f32 %v548_v52, %v545_v53 }
 0x1d0   : > { %v550_v56 = vmax.f32 %v549_v55, 0.0 }
 0x1d2   : > { %1464 = vmatprep.subr.msk.mxu1 %vm592_vm3, %v550_v56 }
 0x1d3   : > { %1465 = vmatpush3.msk.msra.mxu1 %vm592_vm3, %v550_v56 }
 0x1d4   : > { %1467 = vmatmul.mubr.msk.f32.vlgmr.msra.gmra.mrb[0].mxu1 %vm567_vm2, %v552_v57 }
 0x1d5   : > { %1469 = vmatprep.mubr.msk.f32.mxu1 %vm567_vm2, %v553_v58 }
 0x1d8   : > { %1470 = vmatmul.mubr.msk.f32.gmra.mrb[2].mxu1 %vm567_vm2, %v554_v59 }
 0x1d9   : > { %1472 = vmatprep.mubr.msk.f32.mxu1 %vm567_vm2, %v555_v60 }
 0x1dc   : > { %1473 = vmatmul.mubr.msk.f32.gmra.mrb[4].mxu1 %vm567_vm2, %v556_v61 }
 0x1dd   : > { %1475 = vmatprep.mubr.msk.f32.mxu1 %vm567_vm2, %v557_v62 }
 0x1e0   : > { %1476 = vmatmul.mubr.msk.f32.gmra.mrb[6].mxu1 %vm567_vm2, %v558_v63 }
 0x2a7   : > { %v1468_v11 = vpop.f32.mrb[0].mxu1 }
 0x2a8   : > { %v668_v16 = vadd.f32 %v1468_v11, %v560_v7  ;;  %v662_v17 = vpop.f32.mrb[1].mxu1 }
 0x2a9   : > { %v663_v22 = vadd.f32 %v662_v17, %v559_v10 }
 0x2aa   : > { %v1412_v24 = vmul.f32 -1.442695, %v668_v16 }
 0x2ab   : > { %v1411_v26 = vmul.f32 -1.442695, %v663_v22  ;;  %v1471_v27 = vpop.f32.mrb[2].mxu1 }
 0x2ac   : > { %1565 = vpow2.f32 %v1412_v24  ;;  %v678_v28 = vadd.f32 %v1471_v27, %v562_v23  ;;  %v672_v29 = vpop.f32.mrb[3].mxu1 }
 0x2ad   : > { %1567 = vpow2.f32 %v1411_v26  ;;  %v673_v30 = vadd.f32 %v672_v29, %v561_v25 }
 0x2ae   : > { %v1414_v32 = vmul.f32 -1.442695, %v678_v28 }
 0x2af   : > { %v1413_v34 = vmul.f32 -1.442695, %v673_v30  ;;  %v1474_v35 = vpop.f32.mrb[4].mxu1 }
 0x2b0   : > { %1569 = vpow2.f32 %v1414_v32  ;;  %v688_v36 = vadd.f32 %v1474_v35, %v564_v31  ;;  %v682_v37 = vpop.f32.mrb[5].mxu1 }
 0x2b1   : > { %1571 = vpow2.f32 %v1413_v34  ;;  %v683_v38 = vadd.f32 %v682_v37, %v563_v33 }
 0x2b2   : > { %v1416_v39 = vmul.f32 -1.442695, %v688_v36 }
 0x2b3   : > { %v1477_v41 = vpop.f32.mrb[6].mxu1  ;;  %v1415_v42 = vmul.f32 -1.442695, %v683_v38 }
 0x2b4   : > { %1573 = vpow2.f32 %v1416_v39  ;;  %v692_v43 = vpop.f32.mrb[7].mxu1  ;;  %v698_v51 = vadd.f32 %v1477_v41, %v566_v44 }
 0x2b5   : > { %v693_v45 = vadd.f32 %v692_v43, %v565_v40  ;;  %1575 = vpow2.f32 %v1415_v42 }
 0x2b6   : > { %v1566_v46 = vpop.eup %1565  ;;  %v1418_v55 = vmul.f32 -1.442695, %v698_v51 }
 0x2b7   : > { %v1568_v47 = vpop.eup %1567  ;;  %v726_v48 = vadd.f32 1.0, %v1566_v46  ;;  %v1417_v49 = vmul.f32 -1.442695, %v693_v45 }
 0x2b8   : > { %v725_v50 = vadd.f32 1.0, %v1568_v47 }
 0x2b9   : > { %1577 = vrcp.f32 %v726_v48 }
 0x2ba   : > { %v1570_v52 = vpop.eup %1569  ;;  %1579 = vrcp.f32 %v725_v50 }
 0x2bb   : > { %v1572_v53 = vpop.eup %1571  ;;  %v728_v54 = vadd.f32 1.0, %v1570_v52  ;;  %1581 = vpow2.f32 %v1417_v49 }
 0x2bc   : > { %v727_v56 = vadd.f32 1.0, %v1572_v53 }
 0x2bd   : > { %1583 = vrcp.f32 %v728_v54 }
 0x2be   : > { %v1574_v57 = vpop.eup %1573  ;;  %1585 = vpow2.f32 %v1418_v55 }
 0x2bf   : > { %v730_v58 = vadd.f32 1.0, %v1574_v57  ;;  %1587 = vrcp.f32 %v727_v56  ;;  %v1576_v59 = vpop.eup %1575 }
 0x2c0   : > { %v729_v63 = vadd.f32 1.0, %v1576_v59 }
 0x2c1   : > { %1589 = vrcp.f32 %v730_v58 }
 0x2c2   : > { %1591 = vrcp.f32 %v729_v63 }
 0x2c3   : > { %v1578_v60 = vpop.eup %1577 }
 0x2c4   : > { %v1580_v61 = vpop.eup %1579  ;;  %756 = vperm.xlu1 %1564, %v1578_v60  }
 0x2c5   : > { %v1582_v62 = vpop.eup %1581  ;;  %751 = vperm.xlu0 %1563, %v1580_v61  }
 0x2c6   : > { %v731_v7 = vadd.f32 1.0, %v1582_v62 }
 0x2c7   : > { %v1584_v3 = vpop.eup %1583 }
 0x2c8   : > { %766 = vperm.xlu1 %1564, %v1584_v3   ;;  %v1586_v10 = vpop.eup %1585  ;;  %1593 = vrcp.f32 %v731_v7 }
 0x2c9   : > { %v1588_v11 = vpop.eup %1587  ;;  %v732_v17 = vadd.f32 1.0, %v1586_v10 }
 0x2cb   : > { %v1590_v16 = vpop.eup %1589  ;;  %1595 = vrcp.f32 %v732_v17 }
 0x2cc   : > { %761 = vperm.xlu1 %1564, %v1588_v11   ;;  %v1592_v22 = vpop.eup %1591 }
 0x2d0   : > { %776 = vperm.xlu1 %1564, %v1590_v16  }
 0x2d2   : > { %v1594_v23 = vpop.eup %1593 }
 0x2d4   : > { %771 = vperm.xlu1 %1564, %v1592_v22  }
 0x2d5   : > { %v1596_v24 = vpop.eup %1595 }
 0x2d8   : > { %781 = vperm.xlu1 %1564, %v1594_v23  }
 0x2dc   : > { %786 = vperm.xlu1 %1564, %v1596_v24  }
 0x343   : > { %v757_v25 = vpop.permute.xlu1 %756 }
 0x344   : > { %v752_v26 = vpop.permute.xlu0 %751  ;;  %v2050_v28 = vmul.f32 %v757_v25, %v1952_v8  ;;  %v2053_v29 = vmul.f32 %v757_v25, %v1954_v9 }
 0x345   : > { %v2056_v30 = vmul.f32 %v752_v26, %v1940_v2  ;;  %v2059_v31 = vmul.f32 %v752_v26, %v1944_v4 }
 0x347   : > { %v767_v27 = vpop.permute.xlu1 %766  ;;  %v805_v8 = vadd.f32 %v2050_v28, %v2056_v30  ;;  %v818_v9 = vadd.f32 %v2053_v29, %v2059_v31 }
 0x348   : > { %v2074_v4 = vmul.f32 %v767_v27, %v1946_v5 }
 0x34b   : > { %v762_v32 = vpop.permute.xlu1 %761 }
 0x34c   : > { %v2062_v33 = vmul.f32 %v762_v32, %v1936_v0  ;;  %v2065_v34 = vmul.f32 %v762_v32, %v1938_v1  ;;  %v2077_v0 = vmul.f32 %v767_v27, %v1948_v6 }
 0x34e   : > { %v806_v2 = vadd.f32 %v805_v8, %v2062_v33  ;;  %v819_v36 = vadd.f32 %v818_v9, %v2065_v34  ;;  %v833_v46 = vmax.f32 %v2056_v30, %v2062_v33 }
 0x34f   : > { %v777_v35 = vpop.permute.xlu1 %776 }
 0x350   : > { %v807_v39 = vadd.f32 %v806_v2, %v2074_v4  ;;  %v820_v40 = vadd.f32 %v819_v36, %v2077_v0  ;;  %v2088_v41 = vmul.f32 %v777_v35, %v1960_v12  ;;  %v2091_v5 = vmul.f32 %v777_v35, %v1962_v13 }
 0x351   : > { %v834_v12 = vmax.f32 %v2050_v28, %v2074_v4  ;;  %v847_v13 = vmax.f32 %v2053_v29, %v2077_v0 }
 0x353   : > { %v772_v37 = vpop.permute.xlu1 %771  ;;  %v836_v47 = vmax.f32 %v834_v12, %v2088_v41  ;;  %v1028_v12 = vstv %s1391_s28  ;;  %s2148_s28 = sld [smem:[#allocation3 + $0x2]] }
 0x354   : > { %v2080_v1 = vmul.f32 %v772_v37, %v1964_v14  ;;  %v2083_v38 = vmul.f32 %v772_v37, %v1966_v15 }
 0x356   : > { %v808_v6 = vadd.f32 %v807_v39, %v2080_v1  ;;  %v821_v42 = vadd.f32 %v820_v40, %v2083_v38  ;;  %v835_v48 = vmax.f32 %v833_v46, %v2080_v1  ;;  %v1031_v39 = vstv %s2129_s25  ;;  %s2146_s25 = sld [smem:[#allocation3 + $0xa]] }
 0x357   : > { %v782_v43 = vpop.permute.xlu1 %781 }
 0x358   : > { %v2096_v14 = vmul.f32 %v782_v43, %v1976_v20  ;;  %v2099_v15 = vmul.f32 %v782_v43, %v1978_v21  ;;  %v809_v44 = vadd.f32 %v808_v6, %v2088_v41  ;;  %v822_v45 = vadd.f32 %v821_v42, %v2091_v5 }
 0x359   : > { %v846_v20 = vmax.f32 %v2059_v31, %v2065_v34  ;;  %v849_v21 = vmax.f32 %v847_v13, %v2091_v5 }
 0x35a   : > { %v810_v51 = vadd.f32 %v809_v44, %v2096_v14  ;;  %v823_v52 = vadd.f32 %v822_v45, %v2099_v15  ;;  %v837_v55 = vmax.f32 %v835_v48, %v2096_v14 }
 0x35b   : > { %v848_v49 = vmax.f32 %v846_v20, %v2083_v38  ;;  %v787_v50 = vpop.permute.xlu1 %786 }
 0x35c   : > { %v2118_v53 = vmul.f32 %v787_v50, %v1972_v18  ;;  %v2121_v54 = vmul.f32 %v787_v50, %v1974_v19 }
 0x35d   : > { %v850_v56 = vmax.f32 %v848_v49, %v2099_v15 }
 0x35e   : > { %v811_v57 = vadd.f32 %v810_v51, %v2118_v53  ;;  %v824_v58 = vadd.f32 %v823_v52, %v2121_v54  ;;  %v838_v59 = vmax.f32 %v836_v47, %v2118_v53  ;;  %v851_v60 = vmax.f32 %v849_v21, %v2121_v54 }
 0x35f   : > { %v866_v52 = vlaneseq }
 0x360   : > { %v812_v61 = vrot.slane %v811_v57, 4  ;;  %v825_v62 = vrot.slane %v824_v58, 4  ;;  %v839_v63 = vmax.f32 %v837_v55, %v838_v59  ;;  %v852_v18 = vmax.f32 %v850_v56, %v851_v60 }
 0x361   : > { %v2142_v55 = vand.u32 127, %v866_v52  ;;  %v1734_v56 = vmov 1966171168   ;;  %v2153_v60 = vshrl.u32 %v866_v52, 7 }
 0x362   : > { %v813_v3 = vadd.f32 %v812_v61, %v811_v57  ;;  %v826_v7 = vadd.f32 %v825_v62, %v824_v58  ;;  %v840_v19 = vrot.slane %v839_v63, 4  ;;  %v853_v10 = vrot.slane %v852_v18, 4 }
 0x363   : > { %v889_v57 = vunpack.c.l.s4 %v1734_v56  ;;  %vm868_vm5 = vcmp.lt.s32.totalorder %v2142_v55, 17  ;;  %v874_v58 = vstv %s1384_s1  ;;  %vm909_vm6 = vcmp.lt.s32.totalorder %v2142_v55, 16  ;;  %s2171_s1 = sld [smem:[#allocation3 + $0x5]] }
 0x364   : > { %v814_v11 = vrot.slane %v813_v3, 2  ;;  %v827_v16 = vrot.slane %v826_v7, 2  ;;  %v841_v17 = vmax.f32 %v839_v63, %v840_v19  ;;  %v854_v22 = vmax.f32 %v852_v18, %v853_v10  ;;  %v2162_v63 = vld [vmem:[%s2383_s3] sm:$0x3] }
 0x365   : > { %v890_v59 = vunpack.c.0.s8 %v889_v57  ;;  %v2167_v18 = vld [vmem:[%s2384_s4] sm:$0x3]  ;;  %vm396_vm7 = vcmp.ge.s32.totalorder %v2162_v63, 1  ;;  %vm950_vm9 = vcmp.lt.s32.totalorder %v2142_v55, 15  ;;  %vm991_vm10 = vcmp.lt.s32.totalorder %v2142_v55, 1 }
 0x366   : > { %v815_v23 = vadd.f32 %v814_v11, %v813_v3  ;;  %v828_v24 = vadd.f32 %v827_v16, %v826_v7  ;;  %v842_v25 = vrot.slane %v841_v17, 2  ;;  %v855_v26 = vrot.slane %v854_v22, 2 }
 0x367   : > { %v871_v3 = vstv %s2140_s22  ;;  %v2176_v16 = vsub.s32 %v890_v59, %v2153_v60  ;;  %vm397_vm8 = vcmp.ge.s32.totalorder %v2167_v18, 1  ;;  %s2186_s22 = sld [smem:[#allocation3 + $0x6]]  ;;  %vm1065_vm11 = vcmp.lt.s32.totalorder %v2142_v55, 127 }
 0x368   : > { %v816_v27 = vrot.slane %v815_v23, 1  ;;  %v829_v32 = vrot.slane %v828_v24, 1  ;;  %v843_v8 = vmax.f32 %v841_v17, %v842_v25  ;;  %v856_v9 = vmax.f32 %v854_v22, %v855_v26  ;;  %vm398_vm14 = vmand %vm396_vm7, %vm397_vm8 }
 0x369   : > { %v912_v17 = vstv %s2144_s17  ;;  %v915_v22 = vstv %s2146_s25  ;;  %s2191_s17 = sld [smem:[#allocation3 + $0xf]]  ;;  %v1068_v56 = vstv %s2171_s1  ;;  %vm403_vm12 = vcmp.le.s32.totalorder %v2167_v18, 14  ;;  %s1735_s1 = smov [#allocation8]  }
 0x36a   : > { %v817_v35 = vadd.f32 %v816_v27, %v815_v23  ;;  %v830_v2 = vadd.f32 %v829_v32, %v828_v24  ;;  %v844_v36 = vrot.slane %v843_v8, 1  ;;  %v857_v37 = vrot.slane %v856_v9, 1  ;;  %s2200_s25 = sld [smem:[#allocation3 + $0x7]]  ;;  %vm404_vm1 = vmand %vm396_vm7, %vm403_vm12 }
 0x36b   : > { %vm1106_vm13 = vcmp.lt.s32.totalorder %v2142_v55, 113  ;;  %vm1147_vm15 = vcmp.lt.s32.totalorder %v2142_v55, 112  ;;  %vm1188_vm0 = vcmp.lt.s32.totalorder %v2142_v55, 111  ;;  %vm413_vm2 = vcmp.le.s32.totalorder %v2162_v63, 14 }
 0x36c   : > { %v831_v40 = vmul.f32 0.015625, %v817_v35  ;;  %v832_v6 = vmul.f32 0.015625, %v830_v2  ;;  %v845_v42 = vmax.f32 %v843_v8, %v844_v36  ;;  %v858_v43 = vmax.f32 %v856_v9, %v857_v37  ;;  %vm414_vm3 = vmand %vm413_vm2, %vm397_vm8 }
 0x36d   : > { %v953_v35 = vstv %s2148_s28  ;;  %s2231_s28 = sld [smem:[#allocation3 + $0x11]] }
 0x36e   : > { %v860_v44 = vsel %vm859_vm4, %v831_v40, %v845_v42  ;;  %v861_v45 = vsel %vm859_vm4, %v832_v6, %v858_v43  ;;  %vm419_vm4 = vmand %vm413_vm2, %vm403_vm12 }
 0x36f   : > { %864 = vrot.lane.b32.xlu0 %v861_v45, %s1726_s14  ;;  %862 = vrot.lane.b32.xlu1 %v860_v44, %s1726_s14  ;;  %v1033_v13 = vmul.f32 %v1031_v39, %v861_v45  ;;  %v1032_v46 = vmul.f32 %v1031_v39, %v860_v44  ;;  %v1030_v20 = vmul.f32 %v1028_v12, %v861_v45  ;;  %s2151_s14 = sld [smem:[#allocation3 + $0xb]] }
 0x370   : > { %v1029_v21 = vmul.f32 %v1028_v12, %v860_v44 }
 0x371   : > { %v1037_v47 = vrot.slane %v1033_v13, 1  ;;  %v1036_v48 = vrot.slane %v1032_v46, 1 }
 0x373   : > { %907 = vrot.lane.b32.xlu0 %v861_v45, %s2395_s30  ;;  %905 = vrot.lane.b32.xlu1 %v860_v44, %s2395_s30  ;;  %v2134_v49 = vadd.f32 %v1037_v47, %v1030_v20  ;;  %v2136_v50 = vadd.f32 %v1036_v48, %v1029_v21  ;;  %s2173_s30 = sld [smem:[#allocation3 + $0xe]] }
 0x375   : > { %v1044_v51 = vcombine.low %v2136_v50, %v2134_v49  ;;  %v956_v37 = vstv %s2151_s14  ;;  %s2249_s14 = sld [smem:[#allocation3 + $0x8]] }
 0x377   : > { %948 = vrot.lane.b32.xlu0 %v861_v45, %s1728_s21  ;;  %946 = vrot.lane.b32.xlu1 %v860_v44, %s1728_s21  ;;  %s2155_s21 = sld [smem:[#allocation3 + $0x3]] }
 0x379   : > { %v1071_v57 = vstv %s2173_s30  ;;  %s2209_s30 = sld [smem:[#allocation3 + $0x10]] }
 0x37b   : > { %989 = vrot.lane.b32.xlu0 %v861_v45, %s1729_s13  ;;  %987 = vrot.lane.b32.xlu1 %v860_v44, %s1729_s13  ;;  %s2157_s13 = sld [smem:[#allocation3 + $0xc]] }
 0x37d   : > { %v994_v6 = vstv %s2155_s21  ;;  %s1426_s21 = sshll.u32 %s1816_s0, 11 }
 0x37f   : > { %1063 = vrot.lane.b32.xlu0 %v861_v45, %s1730_s24  ;;  %1061 = vrot.lane.b32.xlu1 %v860_v44, %s1730_s24 }
 0x381   : > { %v997_v42 = vstv %s2157_s13  ;;  %s2299_s13 = scalar_lea.vmem [#allocation8], %s1382_s19 }
 0x382   : > { %s1288_s24 = sshll.u32 %s2299_s13, 4  ;;  %s2327_s24 = int_to_ptr.vmem [resolvable:$true] %s1288_s24 }
 0x383   : > { %1104 = vrot.lane.b32.xlu0 %v861_v45, %s1731_s29  ;;  %1102 = vrot.lane.b32.xlu1 %v860_v44, %s1731_s29  ;;  %s2317_s29 = scalar_lea.hbm %s2390_s10, %s1426_s21 }
 0x387   : > { %1145 = vrot.lane.b32.xlu0 %v861_v45, %s1732_s11  ;;  %1143 = vrot.lane.b32.xlu1 %v860_v44, %s1732_s11  ;;  %s1275_s11 = scalar_lea.sflag [#allocation5], %s1926_s23 }
 0x38b   : > { %1186 = vrot.lane.b32.xlu0 %v861_v45, %s1733_s12  ;;  %1184 = vrot.lane.b32.xlu1 %v860_v44, %s1733_s12  ;;  %s1646_s12 = scalar_lea.vmem %s2327_s24, 2048 }
 0x38c   : > { %p1647_p13 = scmp.ne.s32.totalorder %s2327_s24, %s1646_s12 }
 0x38e   : > { %p1648_p8 = pnand %p1647_p13, %p2410_p3 }
 0x390   : > { %p1649_p9 = pneg %p1648_p8 }
 0x3e1   : > { %v865_v61 = vpop.permute.xlu0 %864  ;;  %v863_v62 = vpop.permute.xlu1 %862 }
 0x3e2   : > { %v869_v7 = vsel %vm868_vm5, %v863_v62, %v865_v61  ;;  %v870_v19 = vsel %vm868_vm5, %v865_v61, %v863_v62 }
 0x3e3   : > { %v875_v10 = vmul.f32 %v874_v58, %v870_v19  ;;  %v876_v11 = vmul.f32 %v874_v58, %v869_v7  ;;  %v872_v23 = vmul.f32 %v871_v3, %v870_v19  ;;  %v873_v24 = vmul.f32 %v871_v3, %v869_v7 }
 0x3e5   : > { %v879_v25 = vrot.slane %v875_v10, 1  ;;  %v880_v26 = vrot.slane %v876_v11, 1  ;;  %v908_v27 = vpop.permute.xlu0 %907  ;;  %v906_v32 = vpop.permute.xlu1 %905  ;;  %v2207_v11 = vrot.slane %v1044_v51, %v2176_v16 }
 0x3e6   : > { %v910_v8 = vsel %vm909_vm6, %v906_v32, %v908_v27  ;;  %v911_v9 = vsel %vm909_vm6, %v908_v27, %v906_v32  ;;  %v1109_v27 = vstv %s2186_s22  ;;  %s1650_s22 = sshll.u32 %s1735_s1, 4  ;;  %s1651_s22 = int_to_ptr.vmem [resolvable:$false] %s1650_s22 }
 0x3e7   : > { %v883_v2 = vadd.f32 %v879_v25, %v872_v23  ;;  %v884_v36 = vadd.f32 %v880_v26, %v873_v24  ;;  %v916_v39 = vmul.f32 %v915_v22, %v911_v9  ;;  %v917_v40 = vmul.f32 %v915_v22, %v910_v8  ;;  %p1653_p10 = scmp.lt.s32.totalorder %s2327_s24, %s1651_s22 }
 0x3e8   : > { %v913_v44 = vmul.f32 %v912_v17, %v911_v9  ;;  %v914_v45 = vmul.f32 %v912_v17, %v910_v8 }
 0x3e9   : > { %v887_v43 = vcombine.low %v883_v2, %v884_v36  ;;  %v949_v12 = vpop.permute.xlu0 %948  ;;  %v947_v13 = vpop.permute.xlu1 %946  ;;  %v920_v46 = vrot.slane %v916_v39, 1  ;;  %v921_v20 = vrot.slane %v917_v40, 1  ;;  %v1112_v36 = vstv %s2191_s17  ;;  %s1652_s17 = scalar_lea.vmem %s1651_s22, 4096 }
 0x3ea   : > { %v951_v47 = vsel %vm950_vm9, %v947_v13, %v949_v12  ;;  %v952_v21 = vsel %vm950_vm9, %v949_v12, %v947_v13  ;;  %v1150_v12 = vstv %s2200_s25  ;;  %p1654_p1 = scmp.lt.s32.totalorder %s1652_s17, %s1646_s12 }
 0x3eb   : > { %v894_v48 = vrot.slane %v887_v43, %v2176_v16  ;;  %v957_v52 = vmul.f32 %v956_v37, %v952_v21  ;;  %v924_v58 = vadd.f32 %v920_v46, %v913_v44  ;;  %v925_v59 = vadd.f32 %v921_v20, %v914_v45 }
 0x3ec   : > { %v958_v61 = vmul.f32 %v956_v37, %v951_v47  ;;  %v954_v62 = vmul.f32 %v953_v35, %v952_v21  ;;  %v955_v3 = vmul.f32 %v953_v35, %v951_v47  ;;  %p1655_p4 = por %p1654_p1, %p1653_p10 }
 0x3ed   : > { %v961_v7 = vrot.slane %v957_v52, 1  ;;  %v990_v19 = vpop.permute.xlu0 %989  ;;  %v988_v10 = vpop.permute.xlu1 %987  ;;  %v928_v17 = vcombine.low %v924_v58, %v925_v59  ;;  %v901_v25 = vrot.slane %v894_v48, %v2176_v16  ;;  %v1153_v58 = vstv %s2209_s30 }
 0x3ee   : > { %v962_v22 = vrot.slane %v958_v61, 1  ;;  %v992_v23 = vsel %vm991_vm10, %v988_v10, %v990_v19  ;;  %v993_v24 = vsel %vm991_vm10, %v990_v19, %v988_v10  ;;  %p1656_p11 = pnand %p1655_p4, %p1649_p9 }
 0x3ef   : > { %v965_v26 = vadd.f32 %v961_v7, %v954_v62  ;;  %v935_v49 = vrot.slane %v928_v17, %v2176_v16  ;;  %v998_v51 = vmul.f32 %v997_v42, %v993_v24  ;;  %v999_v32 = vmul.f32 %v997_v42, %v992_v23 }
 0x3f0   : > { %v966_v50 = vadd.f32 %v962_v22, %v955_v3  ;;  %v995_v8 = vmul.f32 %v994_v6, %v993_v24  ;;  %v996_v9 = vmul.f32 %v994_v6, %v992_v23  ;;  %v903_v44 = vsel %vm398_vm14, %v901_v25, 0.0 }
 0x3f1   : > { %v1064_v35 = vpop.permute.xlu0 %1063  ;;  %v1062_v2 = vpop.permute.xlu1 %1061  ;;  %v942_v37 = vrot.slane %v935_v49, %v2176_v16  ;;  %v1002_v40 = vrot.slane %v998_v51, 1  ;;  %v1003_v43 = vrot.slane %v999_v32, 1 }
 0x3f2   : > { %v969_v39 = vcombine.low %v965_v26, %v966_v50  ;;  %v1066_v45 = vsel %vm1065_vm11, %v1062_v2, %v1064_v35  ;;  %v1067_v42 = vsel %vm1065_vm11, %v1064_v35, %v1062_v2 }
 0x3f3   : > { %v944_v6 = vsel %vm396_vm7, %v942_v37, 0.0  ;;  %v1006_v46 = vadd.f32 %v1002_v40, %v995_v8  ;;  %v1007_v20 = vadd.f32 %v1003_v43, %v996_v9  ;;  %v1072_v21 = vmul.f32 %v1071_v57, %v1066_v45 }
 0x3f4   : > { %v976_v13 = vrot.slane %v969_v39, %v2176_v16  ;;  %v945_v47 = vadd.f32 %v944_v6, %v903_v44  ;;  %v1073_v62 = vmul.f32 %v1071_v57, %v1067_v42  ;;  %v1069_v7 = vmul.f32 %v1068_v56, %v1066_v45 }
 0x3f5   : > { %v1105_v48 = vpop.permute.xlu0 %1104  ;;  %v1103_v52 = vpop.permute.xlu1 %1102  ;;  %v1010_v61 = vcombine.low %v1006_v46, %v1007_v20  ;;  %v1076_v19 = vrot.slane %v1072_v21, 1  ;;  %v1070_v23 = vmul.f32 %v1068_v56, %v1067_v42  ;;  %v1194_v40 = vstv %s2231_s28 }
 0x3f6   : > { %v983_v59 = vrot.slane %v976_v13, %v2176_v16  ;;  %v1107_v3 = vsel %vm1106_vm13, %v1103_v52, %v1105_v48  ;;  %v1108_v10 = vsel %vm1106_vm13, %v1105_v48, %v1103_v52  ;;  %v1077_v24 = vrot.slane %v1073_v62, 1 }
 0x3f7   : > { %v1113_v17 = vmul.f32 %v1112_v36, %v1107_v3  ;;  %v1017_v22 = vrot.slane %v1010_v61, %v2176_v16  ;;  %v1110_v25 = vmul.f32 %v1109_v27, %v1107_v3  ;;  %v1080_v26 = vadd.f32 %v1076_v19, %v1069_v7 }
 0x3f8   : > { %v985_v57 = vsel %vm404_vm1, %v983_v59, 0.0  ;;  %v1114_v49 = vmul.f32 %v1112_v36, %v1108_v10  ;;  %v1081_v9 = vadd.f32 %v1077_v24, %v1070_v23  ;;  %v1111_v37 = vmul.f32 %v1109_v27, %v1108_v10 }
 0x3f9   : > { %v1117_v50 = vrot.slane %v1113_v17, 1  ;;  %v1146_v51 = vpop.permute.xlu0 %1145  ;;  %v1144_v32 = vpop.permute.xlu1 %1143  ;;  %v1024_v8 = vrot.slane %v1017_v22, %v2176_v16  ;;  %v986_v43 = vadd.f32 %v985_v57, %v945_v47  ;;  %v1191_v47 = vstv %s2249_s14 }
 0x3fa   : > { %v1148_v35 = vsel %vm1147_vm15, %v1144_v32, %v1146_v51  ;;  %v1149_v2 = vsel %vm1147_vm15, %v1146_v51, %v1144_v32  ;;  %v1118_v56 = vrot.slane %v1114_v49, 1  ;;  %v1084_v44 = vcombine.low %v1080_v26, %v1081_v9 }
 0x3fb   : > { %v1121_v39 = vadd.f32 %v1117_v50, %v1110_v25  ;;  %v1154_v36 = vmul.f32 %v1153_v58, %v1148_v35  ;;  %v1155_v45 = vmul.f32 %v1153_v58, %v1149_v2  ;;  %v1026_v42 = vsel %vm397_vm8, %v1024_v8, 0.0 }
 0x3fc   : > { %v1122_v6 = vadd.f32 %v1118_v56, %v1111_v37  ;;  %v1151_v13 = vmul.f32 %v1150_v12, %v1148_v35  ;;  %v1152_v46 = vmul.f32 %v1150_v12, %v1149_v2  ;;  %v1091_v48 = vrot.slane %v1084_v44, %v2176_v16 }
 0x3fd   : > { %v1187_v20 = vpop.permute.xlu0 %1186  ;;  %v1185_v21 = vpop.permute.xlu1 %1184  ;;  %v1158_v52 = vrot.slane %v1154_v36, 1  ;;  %v1159_v27 = vrot.slane %v1155_v45, 1  ;;  %v1027_v62 = vadd.f32 %v1026_v42, %v986_v43  ;;  %v1058_v22 = vrot.slane %v2207_v11, %v2176_v16 }
 0x3fe   : > { %v1189_v59 = vsel %vm1188_vm0, %v1185_v21, %v1187_v20  ;;  %v1125_v61 = vcombine.low %v1121_v39, %v1122_v6  ;;  %v1190_v58 = vsel %vm1188_vm0, %v1187_v20, %v1185_v21  ;;  %v1098_v12 = vrot.slane %v1091_v48, %v2176_v16 }
 0x3ff   : > { %v1162_v3 = vadd.f32 %v1158_v52, %v1151_v13  ;;  %v1163_v7 = vadd.f32 %v1159_v27, %v1152_v46  ;;  %v1195_v10 = vmul.f32 %v1194_v40, %v1189_v59  ;;  %v1196_v17 = vmul.f32 %v1194_v40, %v1190_v58 }
 0x400   : > { %v1132_v19 = vrot.slane %v1125_v61, %v2176_v16  ;;  %v1192_v24 = vmul.f32 %v1191_v47, %v1189_v59  ;;  %v1193_v55 = vmul.f32 %v1191_v47, %v1190_v58  ;;  %v1060_v49 = vadd.f32 %v1058_v22, %v1027_v62 }
 0x401   : > { %v1166_v23 = vcombine.low %v1162_v3, %v1163_v7  ;;  %v1199_v57 = vrot.slane %v1195_v10, 1  ;;  %v1200_v26 = vrot.slane %v1196_v17, 1  ;;  %v1100_v51 = vsel %vm403_vm12, %v1098_v12, 0.0 }
 0x402   : > { %v1139_v25 = vrot.slane %v1132_v19, %v2176_v16  ;;  %v1101_v2 = vadd.f32 %v1100_v51, %v1060_v49  ;;  %v1234_v13 = vsub.s32 0, %v2153_v60  ;;  %v1238_v46 = vsub.s32 1, %v2153_v60 }
 0x403   : > { %v1173_v50 = vrot.slane %v1166_v23, %v2176_v16  ;;  %v1203_v32 = vadd.f32 %v1199_v57, %v1192_v24  ;;  %v1204_v11 = vadd.f32 %v1200_v26, %v1193_v55 }
 0x404   : > { %v1141_v9 = vsel %vm414_vm3, %v1139_v25, 0.0 }
 0x405   : > { %v1180_v8 = vrot.slane %v1173_v50, %v2176_v16  ;;  %v1207_v35 = vcombine.low %v1203_v32, %v1204_v11  ;;  %v1142_v39 = vadd.f32 %v1141_v9, %v1101_v2 }
 0x407   : > { %v1182_v37 = vsel %vm413_vm2, %v1180_v8, 0.0  ;;  %v1214_v56 = vrot.slane %v1207_v35, %v2176_v16 }
 0x408   : > { %v1183_v43 = vadd.f32 %v1182_v37, %v1142_v39 }
 0x409   : > { %v1221_v40 = vrot.slane %v1214_v56, %v2176_v16 }
 0x40b   : > { %v1223_v44 = vsel %vm419_vm4, %v1221_v40, 0.0 }
 0x40c   : > { %v1224_v36 = vadd.f32 %v1223_v44, %v1183_v43 }
 0x40e   : > { %v1419_v45 = vmul.f32 -1.442695, %v1224_v36 }
 0x410   : > { %1597 = vpow2.f32 %v1419_v45 }
 0x41a   : > { %v1598_v42 = vpop.eup %1597 }
 0x41b   : > { %v1228_v6 = vadd.f32 1.0, %v1598_v42 }
 0x41d   : > { %1599 = vrcp.f32 %v1228_v6 }
 0x427   : > { %v1600_v18 = vpop.eup %1599 }
 0x428   : > { %v1235_v20 = vrot.slane %v1600_v18, %v1234_v13  ;;  %v1239_v63 = vrot.slane %v1600_v18, %v1238_v46 }
 0x42a   : > { %v1242_v21 = vmul.f32 %v1235_v20, %v2056_v30  ;;  %v1243_v16 = vmul.f32 %v1239_v63, %v2059_v31  ;;  %v1244_v48 = vmul.f32 %v1235_v20, %v2050_v28  ;;  %v1245_v52 = vmul.f32 %v1239_v63, %v2053_v29 }
 0x42b   : > { %v1246_v60 = vmul.f32 %v1235_v20, %v2062_v33  ;;  %v1247_v27 = vmul.f32 %v1239_v63, %v2065_v34  ;;  %v1248_v30 = vmul.f32 %v1235_v20, %v2074_v4  ;;  %v1249_v28 = vmul.f32 %v1239_v63, %v2077_v0 }
 0x42c   : > { %v1250_v29 = vmul.f32 %v1235_v20, %v2080_v1  ;;  %v1251_v31 = vmul.f32 %v1239_v63, %v2083_v38  ;;  %v1252_v59 = vmul.f32 %v1235_v20, %v2088_v41  ;;  %v1253_v61 = vmul.f32 %v1239_v63, %v2091_v5  ;;  %1258 = vst [vmem:[%s2299_s13] sm:$0xff] %v1242_v21 }
 0x42d   : > { %1259 = vst [vmem:[%s2299_s13 + $0x8] sm:$0xff] %v1243_v16  ;;  %1260 = vst [vmem:[%s2299_s13 + $0x10] sm:$0xff] %v1244_v48  ;;  %v1254_v33 = vmul.f32 %v1235_v20, %v2096_v14  ;;  %v1255_v34 = vmul.f32 %v1239_v63, %v2099_v15  ;;  %v1256_v4 = vmul.f32 %v1235_v20, %v2118_v53 }
 0x42e   : > { %1261 = vst [vmem:[%s2299_s13 + $0x18] sm:$0xff] %v1245_v52  ;;  %v1257_v0 = vmul.f32 %v1239_v63, %v2121_v54  ;;  %1262 = vst [vmem:[%s2299_s13 + $0x20] sm:$0xff] %v1246_v60 }
 0x42f   : > { %1263 = vst [vmem:[%s2299_s13 + $0x28] sm:$0xff] %v1247_v27  ;;  %1264 = vst [vmem:[%s2299_s13 + $0x30] sm:$0xff] %v1248_v30 }
 0x430   : > { %1265 = vst [vmem:[%s2299_s13 + $0x38] sm:$0xff] %v1249_v28  ;;  %1266 = vst [vmem:[%s2299_s13 + $0x40] sm:$0xff] %v1250_v29 }
 0x431   : > { %1267 = vst [vmem:[%s2299_s13 + $0x48] sm:$0xff] %v1251_v31  ;;  %1268 = vst [vmem:[%s2299_s13 + $0x50] sm:$0xff] %v1252_v59 }
 0x432   : > { %1269 = vst [vmem:[%s2299_s13 + $0x58] sm:$0xff] %v1253_v61  ;;  %1270 = vst [vmem:[%s2299_s13 + $0x60] sm:$0xff] %v1254_v33 }
 0x433   : > { %1271 = vst [vmem:[%s2299_s13 + $0x68] sm:$0xff] %v1255_v34  ;;  %1272 = vst [vmem:[%s2299_s13 + $0x70] sm:$0xff] %v1256_v4 }
 0x434   : > { %1273 = vst [vmem:[%s2299_s13 + $0x78] sm:$0xff] %v1257_v0 }
 0x435   : > { %1659 = shalt.err (!%p1656_p11)
}
 0x436   : > { %s1660_s25 = scalar_lea.hbm %s2317_s29, 2048  ;;  %s1664_s14 = scalar_lea.hbm %s2390_s10, 4096 }
 0x437   : > { %p1661_p0 = scmp.ne.s32.totalorder %s2317_s29, %s1660_s25  ;;  %p1665_p5 = scmp.lt.u32.totalorder %s2317_s29, %s2390_s10 }
 0x438   : > { %p1666_p12 = scmp.lt.u32.totalorder %s1664_s14, %s1660_s25  ;;  %p1668_p13 = scmp.lt.u32.totalorder %s1660_s25, %s2317_s29 }
 0x439   : > { %p1662_p2 = pnand %p1661_p0, %p2410_p3 }
 0x43a   : > { %p1667_p6 = por %p1666_p12, %p1665_p5 }
 0x43b   : > { %p1663_p7 = pneg %p1662_p2 }
 0x43c   : > { %p1669_p8 = por %p1668_p13, %p1667_p6 }
 0x43e   : > { %p1670_p9 = pnand %p1669_p8, %p1663_p7 }
 0x440   : > { %1673 = shalt.err (!%p1670_p9)
}
 0x441   : > { %s1736_s0 = smov 256   ;;  %s2411_s19 = smov 16  }
 0x442   : > { %1496 = dma.vmem_to_hbm [thread:$0]  (%p2410_p3), %s2327_s24, 2048, %s2317_s29, %s1275_s11, %s1736_s0, %s1736_s0, %s2411_s19  }
 0x443 PF: > { %s1303_s12 = sand.u32 1, %s1704_s15   ;;  %p2412_p10 = scmp.ne.s32.totalorder %s2402_s27, 0 }
 0x444   : > { %p2413_p1 = scmp.ge.s32.totalorder %s1716_s18, 2  ;;  %s1304_s1 = scalar_lea.sflag [#allocation5], %s1303_s12 }
 0x446   : > { %p1507_p4 = pnand %p2413_p1, %p2412_p10 }
 0x448   : > { %1699 = dma.done.wait (!%p1507_p4), %s1304_s1, 2048  }
 0x449   : > { %1701 = vsyncadd (!%p1507_p4), %s1304_s1, 4294965248  ;;  %s2414_s26 = sld [smem:[#allocation12_spill]]  ;;  %s2415_s17 = sld [smem:[#allocation13_spill]] }
 0x44a   : > { %p25_p11 = scmp.ge.s32.totalorder %s1820_s20, 4   ;;  %s2416_s15 = smov %s1708_s16 }
 0x44b   : > { %s2418_s18 = smov %s1820_s20 }
 0x44c   :  { %27 = sbr.rel (!%p25_p11) target bundleno = 9 (0x9), region = 110 }
 0x44f   : > { %s2417_s16 = smov %s2414_s26 }
 0x453   :  { %1309 = vsyncpa [#allocation4], 1 }
 0x454   :  { %1311 = vsyncpa [#allocation4 + $0x1], 1 }
 0x455   :  { %1312 = vsyncpa [#allocation5], 1 }
 0x456   :  { %1314 = vsyncpa [#allocation5 + $0x1], 1 }
 0x457   :  { %1315 = vsyncpa [#allocation6], 1 }
 0x458   :  { %1317 = vsyncpa [#allocation6 + $0x1], 1 }

</bundles_post_ra>
